<compile_context>
chip_gen: v5e
topology: v5e:2x2
jax: 0.10.0
libtpu: 0.0.40
codegen_flags: <defaults>
</compile_context>

<pallas_src>
import functools

import jax
import jax.numpy as jnp
from jax.experimental import pallas as pl
from jax.experimental.pallas import tpu as pltpu


def _make_lstm_kernel(B, T, D, H, O, L, mm_dtype=jnp.float32):
    """Builds the fused kernel body.

    mm_dtype: dtype of MXU *activation* operands (weights are already stored in
    this dtype by prepare_params); accumulation is always f32.
    """
    if mm_dtype == jnp.float32:
        cast = lambda v: v
    else:
        cast = lambda v: v.astype(mm_dtype)

    def kernel(x_ref, *rest):
        # rest layout:
        #   per layer l: w_ihT_l (D_l, 4H), w_hhT_l (H, 4H), b_l (1, 4H)
        #   w_linT (H, O), b_lin (1, O)
        #   out_ref (T*B, O)
        #   scratch: pre_ref (T*B, 4H), seq_ref (T*B, H)
        layer_refs = [(rest[3 * l], rest[3 * l + 1], rest[3 * l + 2]) for l in range(L)]
        w_lin_ref = rest[3 * L]
        b_lin_ref = rest[3 * L + 1]
        out_ref = rest[3 * L + 2]
        pre_ref = rest[3 * L + 3]   # (T*B, 4H) hoisted layer-0 pre-gates
        seq_ref = rest[3 * L + 4]   # (T*B, H)  last-layer hidden sequence

        # --- Hoisted layer-0 input projection (off the serial critical path) ----
        # One lane-dense (T*B, D) x (D, 4H) matmul + bias.
        pre_ref[...] = (
            jnp.dot(cast(x_ref[...]), layer_refs[0][0][...],
                    preferred_element_type=jnp.float32)
            + layer_refs[0][2][...])

        # Per-layer weights loaded once (already bf16 if use_bf16_matmul).
        w_hh = [layer_refs[l][1][...] for l in range(L)]
        w_ih = [None] + [layer_refs[l][0][...] for l in range(1, L)]
        bias = [None] + [layer_refs[l][2][...] for l in range(1, L)]

        def lstm_cell(gates, c_prev):
            # Gate columns pre-permuted offline to (i, f, o | g):
            # sigmoid over the first 3H lanes, tanh over the last H lanes only.
            sg = jax.nn.sigmoid(gates[:, :3 * H])
            g_g = jnp.tanh(gates[:, 3 * H:])
            i_g = sg[:, 0:H]
            f_g = sg[:, H:2 * H]
            o_g = sg[:, 2 * H:3 * H]
            c_new = f_g * c_prev + i_g * g_g
            h_new = o_g * jnp.tanh(c_new)
            return h_new, c_new

        h = [jnp.zeros((B, H), jnp.float32) for _ in range(L)]
        c = [jnp.zeros((B, H), jnp.float32) for _ in range(L)]

        # --- Wavefront over (layer, time) -----------------------------------
        # Wavefront w runs (l, t = w - l) for every valid l; the L per-wavefront
        # steps are mutually independent, so their MXU/EUP/VPU work overlaps.
        # Layers visited in reverse order so h[l-1] (still step t's value from
        # the previous wavefront) is consumed before layer l-1 overwrites it.
        # TODO(synk): at larger H, drive the MXU weight-stationary
        # (pltpu.matmul_push_rhs / matmul_acc_lhs) to avoid re-staging W_hh
        # every step; kept as plain jnp.dot here for guaranteed lowering.
        for wv in range(T + L - 1):
            for l in range(L - 1, -1, -1):
                t = wv - l
                if 0 <= t < T:
                    if l == 0:
                        gates = pre_ref[t * B:(t + 1) * B, :] + jnp.dot(
                            cast(h[0]), w_hh[0],
                            preferred_element_type=jnp.float32)
                    else:
                        gates = (bias[l]
                                 + jnp.dot(cast(h[l - 1]), w_ih[l],
                                           preferred_element_type=jnp.float32)
                                 + jnp.dot(cast(h[l]), w_hh[l],
                                           preferred_element_type=jnp.float32))
                    h[l], c[l] = lstm_cell(gates, c[l])
                    if l == L - 1:
                        seq_ref[t * B:(t + 1) * B, :] = h[l]

        # --- Final per-timestep Linear: one (T*B, H) x (H, O) matmul ----------
        out = jnp.dot(cast(seq_ref[...]), w_lin_ref[...],
                      preferred_element_type=jnp.float32) + b_lin_ref[...]
        out_ref[...] = out.astype(out_ref.dtype)

    return kernel


def prepare_params(params, use_bf16_matmul=False):
    """One-time conversion from PyTorch-layout params to kernel-ready layout.

    Pre-transposes W_ih/W_hh/W_lin, combines b_ih+b_hh, permutes the gate
    columns from PyTorch's (i,f,g,o) to (i,f,o,g) so sigmoid/tanh each cover a
    contiguous lane block in the kernel, and optionally casts weights to bf16.
    """
    H = params["layers"][0][1].shape[1]          # w_hh: (4H, H)
    w_dtype = jnp.bfloat16 if use_bf16_matmul else jnp.float32
    # new col j = old col perm[j]:  (i, f, o, g)  <-  (i, f, g, o)
    perm = jnp.concatenate([jnp.arange(0, H), jnp.arange(H, 2 * H),
                            jnp.arange(3 * H, 4 * H), jnp.arange(2 * H, 3 * H)])
    layers = []
    for (w_ih, w_hh, b_ih, b_hh) in params["layers"]:
        layers.append((
            jnp.transpose(w_ih)[:, perm].astype(w_dtype),        # (D_l, 4H)
            jnp.transpose(w_hh)[:, perm].astype(w_dtype),        # (H, 4H)
            (b_ih + b_hh)[perm].reshape(1, 4 * H),               # (1, 4H) f32
        ))
    w_lin, b_lin = params["linear"]
    O = w_lin.shape[0]
    return {"layers": tuple(layers),
            "linear": (jnp.transpose(w_lin).astype(w_dtype),     # (H, O)
                       b_lin.reshape(1, O))}                     # (1, O) f32


@functools.partial(jax.jit, static_argnames=("use_bf16_matmul",))
def lstm_model_forward(x, kparams, use_bf16_matmul=False):
    """x: (B, T, D) float32, kparams from prepare_params(). Returns (B, T, O)."""
    B, T, D = x.shape
    layers = kparams["layers"]
    L = len(layers)
    H = layers[0][1].shape[0]                    # w_hhT: (H, 4H)
    w_linT, b_lin = kparams["linear"]
    O = w_linT.shape[1]

    # Time-major, lane-dense 2-D input slab for the hoisted projection.
    x_tm = jnp.transpose(x, (1, 0, 2)).reshape(T * B, D)

    kernel_inputs = [x_tm]
    for (w_ihT, w_hhT, b) in layers:
        kernel_inputs += [w_ihT, w_hhT, b]
    kernel_inputs += [w_linT, b_lin]

    mm_dtype = jnp.bfloat16 if use_bf16_matmul else jnp.float32
    kernel = _make_lstm_kernel(B, T, D, H, O, L, mm_dtype)

    out_flat = pl.pallas_call(
        kernel,
        out_shape=jax.ShapeDtypeStruct((T * B, O), jnp.float32),
        in_specs=[pl.BlockSpec(memory_space=pltpu.MemorySpace.VMEM)] * len(kernel_inputs),
        out_specs=pl.BlockSpec(memory_space=pltpu.MemorySpace.VMEM),
        scratch_shapes=[pltpu.VMEM((T * B, 4 * H), jnp.float32),   # hoisted pre-gates
                        pltpu.VMEM((T * B, H), jnp.float32)],      # last-layer hidden seq
    )(*kernel_inputs)

    return jnp.transpose(out_flat.reshape(T, B, O), (1, 0, 2))     # back to (B, T, O)


def lstm_model_reference(x, params):
    """Pure-JAX reference mirroring torch.nn.LSTM (batch_first) + Linear."""
    B, T, _ = x.shape
    H = params["layers"][0][1].shape[1]
    seq = x
    for (w_ih, w_hh, b_ih, b_hh) in params["layers"]:
        h = jnp.zeros((B, H), jnp.float32)
        c = jnp.zeros((B, H), jnp.float32)
        outs = []
        for t in range(T):
            gates = seq[:, t, :] @ w_ih.T + b_ih + h @ w_hh.T + b_hh
            i_g = jax.nn.sigmoid(gates[:, 0:H])
            f_g = jax.nn.sigmoid(gates[:, H:2 * H])
            g_g = jnp.tanh(gates[:, 2 * H:3 * H])
            o_g = jax.nn.sigmoid(gates[:, 3 * H:4 * H])
            c = f_g * c + i_g * g_g
            h = o_g * jnp.tanh(c)
            outs.append(h)
        seq = jnp.stack(outs, axis=1)
    w_lin, b_lin = params["linear"]
    return seq @ w_lin.T + b_lin


def init_params(key, input_dim, hidden_dim, output_dim, num_layers):
    """Deterministic synthetic init (uniform(-1/sqrt(H), 1/sqrt(H)), like PyTorch)."""
    bound = 1.0 / jnp.sqrt(hidden_dim)
    layers = []
    for l in range(num_layers):
        d_in = input_dim if l == 0 else hidden_dim
        key, k1, k2, k3, k4 = jax.random.split(key, 5)
        w_ih = jax.random.uniform(k1, (4 * hidden_dim, d_in), jnp.float32, -bound, bound)
        w_hh = jax.random.uniform(k2, (4 * hidden_dim, hidden_dim), jnp.float32, -bound, bound)
        b_ih = jax.random.uniform(k3, (4 * hidden_dim,), jnp.float32, -bound, bound)
        b_hh = jax.random.uniform(k4, (4 * hidden_dim,), jnp.float32, -bound, bound)
        layers.append((w_ih, w_hh, b_ih, b_hh))
    key, k1, k2 = jax.random.split(key, 3)
    lin_bound = 1.0 / jnp.sqrt(hidden_dim)
    w_lin = jax.random.uniform(k1, (output_dim, hidden_dim), jnp.float32, -lin_bound, lin_bound)
    b_lin = jax.random.uniform(k2, (output_dim,), jnp.float32, -lin_bound, lin_bound)
    return {"layers": layers, "linear": (w_lin, b_lin)}


if __name__ == "__main__":
    B, T = 2, 8                 # batch, sequence length
    INPUT_DIM, HIDDEN_DIM, OUTPUT_DIM, NUM_LAYERS = 16, 32, 8, 2

    key = jax.random.PRNGKey(0)
    key, kx = jax.random.split(key)
    x = jax.random.normal(kx, (B, T, INPUT_DIM), jnp.float32)
    params = init_params(key, INPUT_DIM, HIDDEN_DIM, OUTPUT_DIM, NUM_LAYERS)

    # One-time parameter prep (pre-transpose, gate-permute, combine biases).
    # f32 matmuls by default so numerics match the f32 reference at 1e-4;
    # pass use_bf16_matmul=True to both calls for the bf16 MXU path.
    kparams = prepare_params(params)

    out = jax.block_until_ready(lstm_model_forward(x, kparams))
    ref = jax.block_until_ready(lstm_model_reference(x, params))

    assert out.shape == (B, T, OUTPUT_DIM), out.shape
    max_err = float(jnp.max(jnp.abs(out - ref)))
    assert jnp.allclose(out, ref, atol=1e-4, rtol=1e-4), max_err
    print("KERNEL_OK")
</pallas_src>

<mosaic_0001>
module attributes {stable_mosaic.version = 11 : i64} {
  func.func @kernel(%arg0: memref<16x16xf32, #tpu.memory_space<vmem>>, %arg1: memref<16x128xf32, #tpu.memory_space<vmem>>, %arg2: memref<32x128xf32, #tpu.memory_space<vmem>>, %arg3: memref<1x128xf32, #tpu.memory_space<vmem>>, %arg4: memref<32x128xf32, #tpu.memory_space<vmem>>, %arg5: memref<32x128xf32, #tpu.memory_space<vmem>>, %arg6: memref<1x128xf32, #tpu.memory_space<vmem>>, %arg7: memref<32x8xf32, #tpu.memory_space<vmem>>, %arg8: memref<1x8xf32, #tpu.memory_space<vmem>>, %arg9: memref<16x8xf32, #tpu.memory_space<vmem>>, %arg10: memref<16x128xf32, #tpu.memory_space<vmem>>, %arg11: memref<16x32xf32, #tpu.memory_space<vmem>>) attributes {dimension_semantics = [], scalar_prefetch = 0 : i64, scratch_operands = 2 : i64, tpu.core_type = #tpu.core_type<tc>} {
    %c0 = arith.constant 0 : index
    %c0_0 = arith.constant 0 : index
    %0 = vector.load %arg0[%c0, %c0_0] : memref<16x16xf32, #tpu.memory_space<vmem>>, vector<16x16xf32>
    %c0_1 = arith.constant 0 : index
    %c0_2 = arith.constant 0 : index
    %1 = vector.load %arg1[%c0_1, %c0_2] : memref<16x128xf32, #tpu.memory_space<vmem>>, vector<16x128xf32>
    %cst = arith.constant dense<0.000000e+00> : vector<16x128xf32>
    %2 = tpu.matmul %0, %1, %cst {dimension_numbers = #tpu.dot_dimension_numbers<[1], [0], [0], [1], [0, 0, 1, 1], [], []>} : vector<16x16xf32>, vector<16x128xf32>, vector<16x128xf32> -> vector<16x128xf32>
    %c0_3 = arith.constant 0 : index
    %c0_4 = arith.constant 0 : index
    %3 = vector.load %arg3[%c0_3, %c0_4] : memref<1x128xf32, #tpu.memory_space<vmem>>, vector<1x128xf32>
    %4 = vector.broadcast %3 : vector<1x128xf32> to vector<16x128xf32>
    %5 = arith.addf %2, %4 : vector<16x128xf32>
    %c0_5 = arith.constant 0 : index
    %c0_6 = arith.constant 0 : index
    %6 = vector.load %arg10[%c0_5, %c0_6] : memref<16x128xf32, #tpu.memory_space<vmem>>, vector<16x128xf32>
    tpu.vector_store %arg10[%c0_5, %c0_6], %5 {strides = array<i32>} : memref<16x128xf32, #tpu.memory_space<vmem>>, vector<16x128xf32>,
    %c0_7 = arith.constant 0 : index
    %c0_8 = arith.constant 0 : index
    %7 = vector.load %arg2[%c0_7, %c0_8] : memref<32x128xf32, #tpu.memory_space<vmem>>, vector<32x128xf32>
    %c0_9 = arith.constant 0 : index
    %c0_10 = arith.constant 0 : index
    %8 = vector.load %arg5[%c0_9, %c0_10] : memref<32x128xf32, #tpu.memory_space<vmem>>, vector<32x128xf32>
    %c0_11 = arith.constant 0 : index
    %c0_12 = arith.constant 0 : index
    %9 = vector.load %arg4[%c0_11, %c0_12] : memref<32x128xf32, #tpu.memory_space<vmem>>, vector<32x128xf32>
    %c0_13 = arith.constant 0 : index
    %c0_14 = arith.constant 0 : index
    %10 = vector.load %arg6[%c0_13, %c0_14] : memref<1x128xf32, #tpu.memory_space<vmem>>, vector<1x128xf32>
    %cst_15 = arith.constant 0.000000e+00 : f32
    %11 = vector.broadcast %cst_15 : f32 to vector<2x32xf32>
    %cst_16 = arith.constant 0.000000e+00 : f32
    %12 = vector.broadcast %cst_16 : f32 to vector<2x32xf32>
    %cst_17 = arith.constant 0.000000e+00 : f32
    %13 = vector.broadcast %cst_17 : f32 to vector<2x32xf32>
    %cst_18 = arith.constant 0.000000e+00 : f32
    %14 = vector.broadcast %cst_18 : f32 to vector<2x32xf32>
    %c0_19 = arith.constant 0 : index
    %c0_20 = arith.constant 0 : index
    %15 = vector.load %arg10[%c0_19, %c0_20] : memref<16x128xf32, #tpu.memory_space<vmem>>, vector<2x128xf32>
    %cst_21 = arith.constant dense<0.000000e+00> : vector<2x128xf32>
    %16 = tpu.matmul %11, %7, %cst_21 {dimension_numbers = #tpu.dot_dimension_numbers<[1], [0], [0], [1], [0, 0, 1, 1], [], []>} : vector<2x32xf32>, vector<32x128xf32>, vector<2x128xf32> -> vector<2x128xf32>
    %17 = arith.addf %15, %16 : vector<2x128xf32>
    %18 = vector.extract_strided_slice %17 {offsets = [0, 0], sizes = [2, 96], strides = [1, 1]} : vector<2x128xf32> to vector<2x96xf32>
    %19 = arith.negf %18 : vector<2x96xf32>
    %20 = math.exp %19 : vector<2x96xf32>
    %cst_22 = arith.constant 1.000000e+00 : f32
    %21 = vector.broadcast %cst_22 : f32 to vector<2x96xf32>
    %22 = arith.addf %21, %20 : vector<2x96xf32>
    %23 = arith.divf %21, %22 : vector<2x96xf32>
    %24 = vector.extract_strided_slice %17 {offsets = [0, 96], sizes = [2, 32], strides = [1, 1]} : vector<2x128xf32> to vector<2x32xf32>
    %25 = math.tanh %24 : vector<2x32xf32>
    %26 = vector.extract_strided_slice %23 {offsets = [0, 0], sizes = [2, 32], strides = [1, 1]} : vector<2x96xf32> to vector<2x32xf32>
    %27 = vector.extract_strided_slice %23 {offsets = [0, 32], sizes = [2, 32], strides = [1, 1]} : vector<2x96xf32> to vector<2x32xf32>
    %28 = vector.extract_strided_slice %23 {offsets = [0, 64], sizes = [2, 32], strides = [1, 1]} : vector<2x96xf32> to vector<2x32xf32>
    %29 = arith.mulf %27, %13 : vector<2x32xf32>
    %30 = arith.mulf %26, %25 : vector<2x32xf32>
    %31 = arith.addf %29, %30 : vector<2x32xf32>
    %32 = math.tanh %31 : vector<2x32xf32>
    %33 = arith.mulf %28, %32 : vector<2x32xf32>
    %cst_23 = arith.constant dense<0.000000e+00> : vector<2x128xf32>
    %34 = tpu.matmul %33, %9, %cst_23 {dimension_numbers = #tpu.dot_dimension_numbers<[1], [0], [0], [1], [0, 0, 1, 1], [], []>} : vector<2x32xf32>, vector<32x128xf32>, vector<2x128xf32> -> vector<2x128xf32>
    %35 = vector.broadcast %10 : vector<1x128xf32> to vector<2x128xf32>
    %36 = arith.addf %35, %34 : vector<2x128xf32>
    %cst_24 = arith.constant dense<0.000000e+00> : vector<2x128xf32>
    %37 = tpu.matmul %12, %8, %cst_24 {dimension_numbers = #tpu.dot_dimension_numbers<[1], [0], [0], [1], [0, 0, 1, 1], [], []>} : vector<2x32xf32>, vector<32x128xf32>, vector<2x128xf32> -> vector<2x128xf32>
    %38 = arith.addf %36, %37 : vector<2x128xf32>
    %39 = vector.extract_strided_slice %38 {offsets = [0, 0], sizes = [2, 96], strides = [1, 1]} : vector<2x128xf32> to vector<2x96xf32>
    %40 = arith.negf %39 : vector<2x96xf32>
    %41 = math.exp %40 : vector<2x96xf32>
    %cst_25 = arith.constant 1.000000e+00 : f32
    %42 = vector.broadcast %cst_25 : f32 to vector<2x96xf32>
    %43 = arith.addf %42, %41 : vector<2x96xf32>
    %44 = arith.divf %42, %43 : vector<2x96xf32>
    %45 = vector.extract_strided_slice %38 {offsets = [0, 96], sizes = [2, 32], strides = [1, 1]} : vector<2x128xf32> to vector<2x32xf32>
    %46 = math.tanh %45 : vector<2x32xf32>
    %47 = vector.extract_strided_slice %44 {offsets = [0, 0], sizes = [2, 32], strides = [1, 1]} : vector<2x96xf32> to vector<2x32xf32>
    %48 = vector.extract_strided_slice %44 {offsets = [0, 32], sizes = [2, 32], strides = [1, 1]} : vector<2x96xf32> to vector<2x32xf32>
    %49 = vector.extract_strided_slice %44 {offsets = [0, 64], sizes = [2, 32], strides = [1, 1]} : vector<2x96xf32> to vector<2x32xf32>
    %50 = arith.mulf %48, %14 : vector<2x32xf32>
    %51 = arith.mulf %47, %46 : vector<2x32xf32>
    %52 = arith.addf %50, %51 : vector<2x32xf32>
    %53 = math.tanh %52 : vector<2x32xf32>
    %54 = arith.mulf %49, %53 : vector<2x32xf32>
    %c0_26 = arith.constant 0 : index
    %c0_27 = arith.constant 0 : index
    %55 = vector.load %arg11[%c0_26, %c0_27] : memref<16x32xf32, #tpu.memory_space<vmem>>, vector<2x32xf32>
    tpu.vector_store %arg11[%c0_26, %c0_27], %54 {strides = array<i32>} : memref<16x32xf32, #tpu.memory_space<vmem>>, vector<2x32xf32>,
    %c2 = arith.constant 2 : index
    %c0_28 = arith.constant 0 : index
    %56 = vector.load %arg10[%c2, %c0_28] : memref<16x128xf32, #tpu.memory_space<vmem>>, vector<2x128xf32>
    %cst_29 = arith.constant dense<0.000000e+00> : vector<2x128xf32>
    %57 = tpu.matmul %33, %7, %cst_29 {dimension_numbers = #tpu.dot_dimension_numbers<[1], [0], [0], [1], [0, 0, 1, 1], [], []>} : vector<2x32xf32>, vector<32x128xf32>, vector<2x128xf32> -> vector<2x128xf32>
    %58 = arith.addf %56, %57 : vector<2x128xf32>
    %59 = vector.extract_strided_slice %58 {offsets = [0, 0], sizes = [2, 96], strides = [1, 1]} : vector<2x128xf32> to vector<2x96xf32>
    %60 = arith.negf %59 : vector<2x96xf32>
    %61 = math.exp %60 : vector<2x96xf32>
    %cst_30 = arith.constant 1.000000e+00 : f32
    %62 = vector.broadcast %cst_30 : f32 to vector<2x96xf32>
    %63 = arith.addf %62, %61 : vector<2x96xf32>
    %64 = arith.divf %62, %63 : vector<2x96xf32>
    %65 = vector.extract_strided_slice %58 {offsets = [0, 96], sizes = [2, 32], strides = [1, 1]} : vector<2x128xf32> to vector<2x32xf32>
    %66 = math.tanh %65 : vector<2x32xf32>
    %67 = vector.extract_strided_slice %64 {offsets = [0, 0], sizes = [2, 32], strides = [1, 1]} : vector<2x96xf32> to vector<2x32xf32>
    %68 = vector.extract_strided_slice %64 {offsets = [0, 32], sizes = [2, 32], strides = [1, 1]} : vector<2x96xf32> to vector<2x32xf32>
    %69 = vector.extract_strided_slice %64 {offsets = [0, 64], sizes = [2, 32], strides = [1, 1]} : vector<2x96xf32> to vector<2x32xf32>
    %70 = arith.mulf %68, %31 : vector<2x32xf32>
    %71 = arith.mulf %67, %66 : vector<2x32xf32>
    %72 = arith.addf %70, %71 : vector<2x32xf32>
    %73 = math.tanh %72 : vector<2x32xf32>
    %74 = arith.mulf %69, %73 : vector<2x32xf32>
    %cst_31 = arith.constant dense<0.000000e+00> : vector<2x128xf32>
    %75 = tpu.matmul %74, %9, %cst_31 {dimension_numbers = #tpu.dot_dimension_numbers<[1], [0], [0], [1], [0, 0, 1, 1], [], []>} : vector<2x32xf32>, vector<32x128xf32>, vector<2x128xf32> -> vector<2x128xf32>
    %76 = vector.broadcast %10 : vector<1x128xf32> to vector<2x128xf32>
    %77 = arith.addf %76, %75 : vector<2x128xf32>
    %cst_32 = arith.constant dense<0.000000e+00> : vector<2x128xf32>
    %78 = tpu.matmul %54, %8, %cst_32 {dimension_numbers = #tpu.dot_dimension_numbers<[1], [0], [0], [1], [0, 0, 1, 1], [], []>} : vector<2x32xf32>, vector<32x128xf32>, vector<2x128xf32> -> vector<2x128xf32>
    %79 = arith.addf %77, %78 : vector<2x128xf32>
    %80 = vector.extract_strided_slice %79 {offsets = [0, 0], sizes = [2, 96], strides = [1, 1]} : vector<2x128xf32> to vector<2x96xf32>
    %81 = arith.negf %80 : vector<2x96xf32>
    %82 = math.exp %81 : vector<2x96xf32>
    %cst_33 = arith.constant 1.000000e+00 : f32
    %83 = vector.broadcast %cst_33 : f32 to vector<2x96xf32>
    %84 = arith.addf %83, %82 : vector<2x96xf32>
    %85 = arith.divf %83, %84 : vector<2x96xf32>
    %86 = vector.extract_strided_slice %79 {offsets = [0, 96], sizes = [2, 32], strides = [1, 1]} : vector<2x128xf32> to vector<2x32xf32>
    %87 = math.tanh %86 : vector<2x32xf32>
    %88 = vector.extract_strided_slice %85 {offsets = [0, 0], sizes = [2, 32], strides = [1, 1]} : vector<2x96xf32> to vector<2x32xf32>
    %89 = vector.extract_strided_slice %85 {offsets = [0, 32], sizes = [2, 32], strides = [1, 1]} : vector<2x96xf32> to vector<2x32xf32>
    %90 = vector.extract_strided_slice %85 {offsets = [0, 64], sizes = [2, 32], strides = [1, 1]} : vector<2x96xf32> to vector<2x32xf32>
    %91 = arith.mulf %89, %52 : vector<2x32xf32>
    %92 = arith.mulf %88, %87 : vector<2x32xf32>
    %93 = arith.addf %91, %92 : vector<2x32xf32>
    %94 = math.tanh %93 : vector<2x32xf32>
    %95 = arith.mulf %90, %94 : vector<2x32xf32>
    %c2_34 = arith.constant 2 : index
    %c0_35 = arith.constant 0 : index
    %96 = vector.load %arg11[%c2_34, %c0_35] : memref<16x32xf32, #tpu.memory_space<vmem>>, vector<2x32xf32>
    tpu.vector_store %arg11[%c2_34, %c0_35], %95 {strides = array<i32>} : memref<16x32xf32, #tpu.memory_space<vmem>>, vector<2x32xf32>,
    %c4 = arith.constant 4 : index
    %c0_36 = arith.constant 0 : index
    %97 = vector.load %arg10[%c4, %c0_36] : memref<16x128xf32, #tpu.memory_space<vmem>>, vector<2x128xf32>
    %cst_37 = arith.constant dense<0.000000e+00> : vector<2x128xf32>
    %98 = tpu.matmul %74, %7, %cst_37 {dimension_numbers = #tpu.dot_dimension_numbers<[1], [0], [0], [1], [0, 0, 1, 1], [], []>} : vector<2x32xf32>, vector<32x128xf32>, vector<2x128xf32> -> vector<2x128xf32>
    %99 = arith.addf %97, %98 : vector<2x128xf32>
    %100 = vector.extract_strided_slice %99 {offsets = [0, 0], sizes = [2, 96], strides = [1, 1]} : vector<2x128xf32> to vector<2x96xf32>
    %101 = arith.negf %100 : vector<2x96xf32>
    %102 = math.exp %101 : vector<2x96xf32>
    %cst_38 = arith.constant 1.000000e+00 : f32
    %103 = vector.broadcast %cst_38 : f32 to vector<2x96xf32>
    %104 = arith.addf %103, %102 : vector<2x96xf32>
    %105 = arith.divf %103, %104 : vector<2x96xf32>
    %106 = vector.extract_strided_slice %99 {offsets = [0, 96], sizes = [2, 32], strides = [1, 1]} : vector<2x128xf32> to vector<2x32xf32>
    %107 = math.tanh %106 : vector<2x32xf32>
    %108 = vector.extract_strided_slice %105 {offsets = [0, 0], sizes = [2, 32], strides = [1, 1]} : vector<2x96xf32> to vector<2x32xf32>
    %109 = vector.extract_strided_slice %105 {offsets = [0, 32], sizes = [2, 32], strides = [1, 1]} : vector<2x96xf32> to vector<2x32xf32>
    %110 = vector.extract_strided_slice %105 {offsets = [0, 64], sizes = [2, 32], strides = [1, 1]} : vector<2x96xf32> to vector<2x32xf32>
    %111 = arith.mulf %109, %72 : vector<2x32xf32>
    %112 = arith.mulf %108, %107 : vector<2x32xf32>
    %113 = arith.addf %111, %112 : vector<2x32xf32>
    %114 = math.tanh %113 : vector<2x32xf32>
    %115 = arith.mulf %110, %114 : vector<2x32xf32>
    %cst_39 = arith.constant dense<0.000000e+00> : vector<2x128xf32>
    %116 = tpu.matmul %115, %9, %cst_39 {dimension_numbers = #tpu.dot_dimension_numbers<[1], [0], [0], [1], [0, 0, 1, 1], [], []>} : vector<2x32xf32>, vector<32x128xf32>, vector<2x128xf32> -> vector<2x128xf32>
    %117 = vector.broadcast %10 : vector<1x128xf32> to vector<2x128xf32>
    %118 = arith.addf %117, %116 : vector<2x128xf32>
    %cst_40 = arith.constant dense<0.000000e+00> : vector<2x128xf32>
    %119 = tpu.matmul %95, %8, %cst_40 {dimension_numbers = #tpu.dot_dimension_numbers<[1], [0], [0], [1], [0, 0, 1, 1], [], []>} : vector<2x32xf32>, vector<32x128xf32>, vector<2x128xf32> -> vector<2x128xf32>
    %120 = arith.addf %118, %119 : vector<2x128xf32>
    %121 = vector.extract_strided_slice %120 {offsets = [0, 0], sizes = [2, 96], strides = [1, 1]} : vector<2x128xf32> to vector<2x96xf32>
    %122 = arith.negf %121 : vector<2x96xf32>
    %123 = math.exp %122 : vector<2x96xf32>
    %cst_41 = arith.constant 1.000000e+00 : f32
    %124 = vector.broadcast %cst_41 : f32 to vector<2x96xf32>
    %125 = arith.addf %124, %123 : vector<2x96xf32>
    %126 = arith.divf %124, %125 : vector<2x96xf32>
    %127 = vector.extract_strided_slice %120 {offsets = [0, 96], sizes = [2, 32], strides = [1, 1]} : vector<2x128xf32> to vector<2x32xf32>
    %128 = math.tanh %127 : vector<2x32xf32>
    %129 = vector.extract_strided_slice %126 {offsets = [0, 0], sizes = [2, 32], strides = [1, 1]} : vector<2x96xf32> to vector<2x32xf32>
    %130 = vector.extract_strided_slice %126 {offsets = [0, 32], sizes = [2, 32], strides = [1, 1]} : vector<2x96xf32> to vector<2x32xf32>
    %131 = vector.extract_strided_slice %126 {offsets = [0, 64], sizes = [2, 32], strides = [1, 1]} : vector<2x96xf32> to vector<2x32xf32>
    %132 = arith.mulf %130, %93 : vector<2x32xf32>
    %133 = arith.mulf %129, %128 : vector<2x32xf32>
    %134 = arith.addf %132, %133 : vector<2x32xf32>
    %135 = math.tanh %134 : vector<2x32xf32>
    %136 = arith.mulf %131, %135 : vector<2x32xf32>
    %c4_42 = arith.constant 4 : index
    %c0_43 = arith.constant 0 : index
    %137 = vector.load %arg11[%c4_42, %c0_43] : memref<16x32xf32, #tpu.memory_space<vmem>>, vector<2x32xf32>
    tpu.vector_store %arg11[%c4_42, %c0_43], %136 {strides = array<i32>} : memref<16x32xf32, #tpu.memory_space<vmem>>, vector<2x32xf32>,
    %c6 = arith.constant 6 : index
    %c0_44 = arith.constant 0 : index
    %138 = vector.load %arg10[%c6, %c0_44] : memref<16x128xf32, #tpu.memory_space<vmem>>, vector<2x128xf32>
    %cst_45 = arith.constant dense<0.000000e+00> : vector<2x128xf32>
    %139 = tpu.matmul %115, %7, %cst_45 {dimension_numbers = #tpu.dot_dimension_numbers<[1], [0], [0], [1], [0, 0, 1, 1], [], []>} : vector<2x32xf32>, vector<32x128xf32>, vector<2x128xf32> -> vector<2x128xf32>
    %140 = arith.addf %138, %139 : vector<2x128xf32>
    %141 = vector.extract_strided_slice %140 {offsets = [0, 0], sizes = [2, 96], strides = [1, 1]} : vector<2x128xf32> to vector<2x96xf32>
    %142 = arith.negf %141 : vector<2x96xf32>
    %143 = math.exp %142 : vector<2x96xf32>
    %cst_46 = arith.constant 1.000000e+00 : f32
    %144 = vector.broadcast %cst_46 : f32 to vector<2x96xf32>
    %145 = arith.addf %144, %143 : vector<2x96xf32>
    %146 = arith.divf %144, %145 : vector<2x96xf32>
    %147 = vector.extract_strided_slice %140 {offsets = [0, 96], sizes = [2, 32], strides = [1, 1]} : vector<2x128xf32> to vector<2x32xf32>
    %148 = math.tanh %147 : vector<2x32xf32>
    %149 = vector.extract_strided_slice %146 {offsets = [0, 0], sizes = [2, 32], strides = [1, 1]} : vector<2x96xf32> to vector<2x32xf32>
    %150 = vector.extract_strided_slice %146 {offsets = [0, 32], sizes = [2, 32], strides = [1, 1]} : vector<2x96xf32> to vector<2x32xf32>
    %151 = vector.extract_strided_slice %146 {offsets = [0, 64], sizes = [2, 32], strides = [1, 1]} : vector<2x96xf32> to vector<2x32xf32>
    %152 = arith.mulf %150, %113 : vector<2x32xf32>
    %153 = arith.mulf %149, %148 : vector<2x32xf32>
    %154 = arith.addf %152, %153 : vector<2x32xf32>
    %155 = math.tanh %154 : vector<2x32xf32>
    %156 = arith.mulf %151, %155 : vector<2x32xf32>
    %cst_47 = arith.constant dense<0.000000e+00> : vector<2x128xf32>
    %157 = tpu.matmul %156, %9, %cst_47 {dimension_numbers = #tpu.dot_dimension_numbers<[1], [0], [0], [1], [0, 0, 1, 1], [], []>} : vector<2x32xf32>, vector<32x128xf32>, vector<2x128xf32> -> vector<2x128xf32>
    %158 = vector.broadcast %10 : vector<1x128xf32> to vector<2x128xf32>
    %159 = arith.addf %158, %157 : vector<2x128xf32>
    %cst_48 = arith.constant dense<0.000000e+00> : vector<2x128xf32>
    %160 = tpu.matmul %136, %8, %cst_48 {dimension_numbers = #tpu.dot_dimension_numbers<[1], [0], [0], [1], [0, 0, 1, 1], [], []>} : vector<2x32xf32>, vector<32x128xf32>, vector<2x128xf32> -> vector<2x128xf32>
    %161 = arith.addf %159, %160 : vector<2x128xf32>
    %162 = vector.extract_strided_slice %161 {offsets = [0, 0], sizes = [2, 96], strides = [1, 1]} : vector<2x128xf32> to vector<2x96xf32>
    %163 = arith.negf %162 : vector<2x96xf32>
    %164 = math.exp %163 : vector<2x96xf32>
    %cst_49 = arith.constant 1.000000e+00 : f32
    %165 = vector.broadcast %cst_49 : f32 to vector<2x96xf32>
    %166 = arith.addf %165, %164 : vector<2x96xf32>
    %167 = arith.divf %165, %166 : vector<2x96xf32>
    %168 = vector.extract_strided_slice %161 {offsets = [0, 96], sizes = [2, 32], strides = [1, 1]} : vector<2x128xf32> to vector<2x32xf32>
    %169 = math.tanh %168 : vector<2x32xf32>
    %170 = vector.extract_strided_slice %167 {offsets = [0, 0], sizes = [2, 32], strides = [1, 1]} : vector<2x96xf32> to vector<2x32xf32>
    %171 = vector.extract_strided_slice %167 {offsets = [0, 32], sizes = [2, 32], strides = [1, 1]} : vector<2x96xf32> to vector<2x32xf32>
    %172 = vector.extract_strided_slice %167 {offsets = [0, 64], sizes = [2, 32], strides = [1, 1]} : vector<2x96xf32> to vector<2x32xf32>
    %173 = arith.mulf %171, %134 : vector<2x32xf32>
    %174 = arith.mulf %170, %169 : vector<2x32xf32>
    %175 = arith.addf %173, %174 : vector<2x32xf32>
    %176 = math.tanh %175 : vector<2x32xf32>
    %177 = arith.mulf %172, %176 : vector<2x32xf32>
    %c6_50 = arith.constant 6 : index
    %c0_51 = arith.constant 0 : index
    %178 = vector.load %arg11[%c6_50, %c0_51] : memref<16x32xf32, #tpu.memory_space<vmem>>, vector<2x32xf32>
    tpu.vector_store %arg11[%c6_50, %c0_51], %177 {strides = array<i32>} : memref<16x32xf32, #tpu.memory_space<vmem>>, vector<2x32xf32>,
    %c8 = arith.constant 8 : index
    %c0_52 = arith.constant 0 : index
    %179 = vector.load %arg10[%c8, %c0_52] : memref<16x128xf32, #tpu.memory_space<vmem>>, vector<2x128xf32>
    %cst_53 = arith.constant dense<0.000000e+00> : vector<2x128xf32>
    %180 = tpu.matmul %156, %7, %cst_53 {dimension_numbers = #tpu.dot_dimension_numbers<[1], [0], [0], [1], [0, 0, 1, 1], [], []>} : vector<2x32xf32>, vector<32x128xf32>, vector<2x128xf32> -> vector<2x128xf32>
    %181 = arith.addf %179, %180 : vector<2x128xf32>
    %182 = vector.extract_strided_slice %181 {offsets = [0, 0], sizes = [2, 96], strides = [1, 1]} : vector<2x128xf32> to vector<2x96xf32>
    %183 = arith.negf %182 : vector<2x96xf32>
    %184 = math.exp %183 : vector<2x96xf32>
    %cst_54 = arith.constant 1.000000e+00 : f32
    %185 = vector.broadcast %cst_54 : f32 to vector<2x96xf32>
    %186 = arith.addf %185, %184 : vector<2x96xf32>
    %187 = arith.divf %185, %186 : vector<2x96xf32>
    %188 = vector.extract_strided_slice %181 {offsets = [0, 96], sizes = [2, 32], strides = [1, 1]} : vector<2x128xf32> to vector<2x32xf32>
    %189 = math.tanh %188 : vector<2x32xf32>
    %190 = vector.extract_strided_slice %187 {offsets = [0, 0], sizes = [2, 32], strides = [1, 1]} : vector<2x96xf32> to vector<2x32xf32>
    %191 = vector.extract_strided_slice %187 {offsets = [0, 32], sizes = [2, 32], strides = [1, 1]} : vector<2x96xf32> to vector<2x32xf32>
    %192 = vector.extract_strided_slice %187 {offsets = [0, 64], sizes = [2, 32], strides = [1, 1]} : vector<2x96xf32> to vector<2x32xf32>
    %193 = arith.mulf %191, %154 : vector<2x32xf32>
    %194 = arith.mulf %190, %189 : vector<2x32xf32>
    %195 = arith.addf %193, %194 : vector<2x32xf32>
    %196 = math.tanh %195 : vector<2x32xf32>
    %197 = arith.mulf %192, %196 : vector<2x32xf32>
    %cst_55 = arith.constant dense<0.000000e+00> : vector<2x128xf32>
    %198 = tpu.matmul %197, %9, %cst_55 {dimension_numbers = #tpu.dot_dimension_numbers<[1], [0], [0], [1], [0, 0, 1, 1], [], []>} : vector<2x32xf32>, vector<32x128xf32>, vector<2x128xf32> -> vector<2x128xf32>
    %199 = vector.broadcast %10 : vector<1x128xf32> to vector<2x128xf32>
    %200 = arith.addf %199, %198 : vector<2x128xf32>
    %cst_56 = arith.constant dense<0.000000e+00> : vector<2x128xf32>
    %201 = tpu.matmul %177, %8, %cst_56 {dimension_numbers = #tpu.dot_dimension_numbers<[1], [0], [0], [1], [0, 0, 1, 1], [], []>} : vector<2x32xf32>, vector<32x128xf32>, vector<2x128xf32> -> vector<2x128xf32>
    %202 = arith.addf %200, %201 : vector<2x128xf32>
    %203 = vector.extract_strided_slice %202 {offsets = [0, 0], sizes = [2, 96], strides = [1, 1]} : vector<2x128xf32> to vector<2x96xf32>
    %204 = arith.negf %203 : vector<2x96xf32>
    %205 = math.exp %204 : vector<2x96xf32>
    %cst_57 = arith.constant 1.000000e+00 : f32
    %206 = vector.broadcast %cst_57 : f32 to vector<2x96xf32>
    %207 = arith.addf %206, %205 : vector<2x96xf32>
    %208 = arith.divf %206, %207 : vector<2x96xf32>
    %209 = vector.extract_strided_slice %202 {offsets = [0, 96], sizes = [2, 32], strides = [1, 1]} : vector<2x128xf32> to vector<2x32xf32>
    %210 = math.tanh %209 : vector<2x32xf32>
    %211 = vector.extract_strided_slice %208 {offsets = [0, 0], sizes = [2, 32], strides = [1, 1]} : vector<2x96xf32> to vector<2x32xf32>
    %212 = vector.extract_strided_slice %208 {offsets = [0, 32], sizes = [2, 32], strides = [1, 1]} : vector<2x96xf32> to vector<2x32xf32>
    %213 = vector.extract_strided_slice %208 {offsets = [0, 64], sizes = [2, 32], strides = [1, 1]} : vector<2x96xf32> to vector<2x32xf32>
    %214 = arith.mulf %212, %175 : vector<2x32xf32>
    %215 = arith.mulf %211, %210 : vector<2x32xf32>
    %216 = arith.addf %214, %215 : vector<2x32xf32>
    %217 = math.tanh %216 : vector<2x32xf32>
    %218 = arith.mulf %213, %217 : vector<2x32xf32>
    %c8_58 = arith.constant 8 : index
    %c0_59 = arith.constant 0 : index
    %219 = vector.load %arg11[%c8_58, %c0_59] : memref<16x32xf32, #tpu.memory_space<vmem>>, vector<2x32xf32>
    tpu.vector_store %arg11[%c8_58, %c0_59], %218 {strides = array<i32>} : memref<16x32xf32, #tpu.memory_space<vmem>>, vector<2x32xf32>,
    %c10 = arith.constant 10 : index
    %c0_60 = arith.constant 0 : index
    %220 = vector.load %arg10[%c10, %c0_60] : memref<16x128xf32, #tpu.memory_space<vmem>>, vector<2x128xf32>
    %cst_61 = arith.constant dense<0.000000e+00> : vector<2x128xf32>
    %221 = tpu.matmul %197, %7, %cst_61 {dimension_numbers = #tpu.dot_dimension_numbers<[1], [0], [0], [1], [0, 0, 1, 1], [], []>} : vector<2x32xf32>, vector<32x128xf32>, vector<2x128xf32> -> vector<2x128xf32>
    %222 = arith.addf %220, %221 : vector<2x128xf32>
    %223 = vector.extract_strided_slice %222 {offsets = [0, 0], sizes = [2, 96], strides = [1, 1]} : vector<2x128xf32> to vector<2x96xf32>
    %224 = arith.negf %223 : vector<2x96xf32>
    %225 = math.exp %224 : vector<2x96xf32>
    %cst_62 = arith.constant 1.000000e+00 : f32
    %226 = vector.broadcast %cst_62 : f32 to vector<2x96xf32>
    %227 = arith.addf %226, %225 : vector<2x96xf32>
    %228 = arith.divf %226, %227 : vector<2x96xf32>
    %229 = vector.extract_strided_slice %222 {offsets = [0, 96], sizes = [2, 32], strides = [1, 1]} : vector<2x128xf32> to vector<2x32xf32>
    %230 = math.tanh %229 : vector<2x32xf32>
    %231 = vector.extract_strided_slice %228 {offsets = [0, 0], sizes = [2, 32], strides = [1, 1]} : vector<2x96xf32> to vector<2x32xf32>
    %232 = vector.extract_strided_slice %228 {offsets = [0, 32], sizes = [2, 32], strides = [1, 1]} : vector<2x96xf32> to vector<2x32xf32>
    %233 = vector.extract_strided_slice %228 {offsets = [0, 64], sizes = [2, 32], strides = [1, 1]} : vector<2x96xf32> to vector<2x32xf32>
    %234 = arith.mulf %232, %195 : vector<2x32xf32>
    %235 = arith.mulf %231, %230 : vector<2x32xf32>
    %236 = arith.addf %234, %235 : vector<2x32xf32>
    %237 = math.tanh %236 : vector<2x32xf32>
    %238 = arith.mulf %233, %237 : vector<2x32xf32>
    %cst_63 = arith.constant dense<0.000000e+00> : vector<2x128xf32>
    %239 = tpu.matmul %238, %9, %cst_63 {dimension_numbers = #tpu.dot_dimension_numbers<[1], [0], [0], [1], [0, 0, 1, 1], [], []>} : vector<2x32xf32>, vector<32x128xf32>, vector<2x128xf32> -> vector<2x128xf32>
    %240 = vector.broadcast %10 : vector<1x128xf32> to vector<2x128xf32>
    %241 = arith.addf %240, %239 : vector<2x128xf32>
    %cst_64 = arith.constant dense<0.000000e+00> : vector<2x128xf32>
    %242 = tpu.matmul %218, %8, %cst_64 {dimension_numbers = #tpu.dot_dimension_numbers<[1], [0], [0], [1], [0, 0, 1, 1], [], []>} : vector<2x32xf32>, vector<32x128xf32>, vector<2x128xf32> -> vector<2x128xf32>
    %243 = arith.addf %241, %242 : vector<2x128xf32>
    %244 = vector.extract_strided_slice %243 {offsets = [0, 0], sizes = [2, 96], strides = [1, 1]} : vector<2x128xf32> to vector<2x96xf32>
    %245 = arith.negf %244 : vector<2x96xf32>
    %246 = math.exp %245 : vector<2x96xf32>
    %cst_65 = arith.constant 1.000000e+00 : f32
    %247 = vector.broadcast %cst_65 : f32 to vector<2x96xf32>
    %248 = arith.addf %247, %246 : vector<2x96xf32>
    %249 = arith.divf %247, %248 : vector<2x96xf32>
    %250 = vector.extract_strided_slice %243 {offsets = [0, 96], sizes = [2, 32], strides = [1, 1]} : vector<2x128xf32> to vector<2x32xf32>
    %251 = math.tanh %250 : vector<2x32xf32>
    %252 = vector.extract_strided_slice %249 {offsets = [0, 0], sizes = [2, 32], strides = [1, 1]} : vector<2x96xf32> to vector<2x32xf32>
    %253 = vector.extract_strided_slice %249 {offsets = [0, 32], sizes = [2, 32], strides = [1, 1]} : vector<2x96xf32> to vector<2x32xf32>
    %254 = vector.extract_strided_slice %249 {offsets = [0, 64], sizes = [2, 32], strides = [1, 1]} : vector<2x96xf32> to vector<2x32xf32>
    %255 = arith.mulf %253, %216 : vector<2x32xf32>
    %256 = arith.mulf %252, %251 : vector<2x32xf32>
    %257 = arith.addf %255, %256 : vector<2x32xf32>
    %258 = math.tanh %257 : vector<2x32xf32>
    %259 = arith.mulf %254, %258 : vector<2x32xf32>
    %c10_66 = arith.constant 10 : index
    %c0_67 = arith.constant 0 : index
    %260 = vector.load %arg11[%c10_66, %c0_67] : memref<16x32xf32, #tpu.memory_space<vmem>>, vector<2x32xf32>
    tpu.vector_store %arg11[%c10_66, %c0_67], %259 {strides = array<i32>} : memref<16x32xf32, #tpu.memory_space<vmem>>, vector<2x32xf32>,
    %c12 = arith.constant 12 : index
    %c0_68 = arith.constant 0 : index
    %261 = vector.load %arg10[%c12, %c0_68] : memref<16x128xf32, #tpu.memory_space<vmem>>, vector<2x128xf32>
    %cst_69 = arith.constant dense<0.000000e+00> : vector<2x128xf32>
    %262 = tpu.matmul %238, %7, %cst_69 {dimension_numbers = #tpu.dot_dimension_numbers<[1], [0], [0], [1], [0, 0, 1, 1], [], []>} : vector<2x32xf32>, vector<32x128xf32>, vector<2x128xf32> -> vector<2x128xf32>
    %263 = arith.addf %261, %262 : vector<2x128xf32>
    %264 = vector.extract_strided_slice %263 {offsets = [0, 0], sizes = [2, 96], strides = [1, 1]} : vector<2x128xf32> to vector<2x96xf32>
    %265 = arith.negf %264 : vector<2x96xf32>
    %266 = math.exp %265 : vector<2x96xf32>
    %cst_70 = arith.constant 1.000000e+00 : f32
    %267 = vector.broadcast %cst_70 : f32 to vector<2x96xf32>
    %268 = arith.addf %267, %266 : vector<2x96xf32>
    %269 = arith.divf %267, %268 : vector<2x96xf32>
    %270 = vector.extract_strided_slice %263 {offsets = [0, 96], sizes = [2, 32], strides = [1, 1]} : vector<2x128xf32> to vector<2x32xf32>
    %271 = math.tanh %270 : vector<2x32xf32>
    %272 = vector.extract_strided_slice %269 {offsets = [0, 0], sizes = [2, 32], strides = [1, 1]} : vector<2x96xf32> to vector<2x32xf32>
    %273 = vector.extract_strided_slice %269 {offsets = [0, 32], sizes = [2, 32], strides = [1, 1]} : vector<2x96xf32> to vector<2x32xf32>
    %274 = vector.extract_strided_slice %269 {offsets = [0, 64], sizes = [2, 32], strides = [1, 1]} : vector<2x96xf32> to vector<2x32xf32>
    %275 = arith.mulf %273, %236 : vector<2x32xf32>
    %276 = arith.mulf %272, %271 : vector<2x32xf32>
    %277 = arith.addf %275, %276 : vector<2x32xf32>
    %278 = math.tanh %277 : vector<2x32xf32>
    %279 = arith.mulf %274, %278 : vector<2x32xf32>
    %cst_71 = arith.constant dense<0.000000e+00> : vector<2x128xf32>
    %280 = tpu.matmul %279, %9, %cst_71 {dimension_numbers = #tpu.dot_dimension_numbers<[1], [0], [0], [1], [0, 0, 1, 1], [], []>} : vector<2x32xf32>, vector<32x128xf32>, vector<2x128xf32> -> vector<2x128xf32>
    %281 = vector.broadcast %10 : vector<1x128xf32> to vector<2x128xf32>
    %282 = arith.addf %281, %280 : vector<2x128xf32>
    %cst_72 = arith.constant dense<0.000000e+00> : vector<2x128xf32>
    %283 = tpu.matmul %259, %8, %cst_72 {dimension_numbers = #tpu.dot_dimension_numbers<[1], [0], [0], [1], [0, 0, 1, 1], [], []>} : vector<2x32xf32>, vector<32x128xf32>, vector<2x128xf32> -> vector<2x128xf32>
    %284 = arith.addf %282, %283 : vector<2x128xf32>
    %285 = vector.extract_strided_slice %284 {offsets = [0, 0], sizes = [2, 96], strides = [1, 1]} : vector<2x128xf32> to vector<2x96xf32>
    %286 = arith.negf %285 : vector<2x96xf32>
    %287 = math.exp %286 : vector<2x96xf32>
    %cst_73 = arith.constant 1.000000e+00 : f32
    %288 = vector.broadcast %cst_73 : f32 to vector<2x96xf32>
    %289 = arith.addf %288, %287 : vector<2x96xf32>
    %290 = arith.divf %288, %289 : vector<2x96xf32>
    %291 = vector.extract_strided_slice %284 {offsets = [0, 96], sizes = [2, 32], strides = [1, 1]} : vector<2x128xf32> to vector<2x32xf32>
    %292 = math.tanh %291 : vector<2x32xf32>
    %293 = vector.extract_strided_slice %290 {offsets = [0, 0], sizes = [2, 32], strides = [1, 1]} : vector<2x96xf32> to vector<2x32xf32>
    %294 = vector.extract_strided_slice %290 {offsets = [0, 32], sizes = [2, 32], strides = [1, 1]} : vector<2x96xf32> to vector<2x32xf32>
    %295 = vector.extract_strided_slice %290 {offsets = [0, 64], sizes = [2, 32], strides = [1, 1]} : vector<2x96xf32> to vector<2x32xf32>
    %296 = arith.mulf %294, %257 : vector<2x32xf32>
    %297 = arith.mulf %293, %292 : vector<2x32xf32>
    %298 = arith.addf %296, %297 : vector<2x32xf32>
    %299 = math.tanh %298 : vector<2x32xf32>
    %300 = arith.mulf %295, %299 : vector<2x32xf32>
    %c12_74 = arith.constant 12 : index
    %c0_75 = arith.constant 0 : index
    %301 = vector.load %arg11[%c12_74, %c0_75] : memref<16x32xf32, #tpu.memory_space<vmem>>, vector<2x32xf32>
    tpu.vector_store %arg11[%c12_74, %c0_75], %300 {strides = array<i32>} : memref<16x32xf32, #tpu.memory_space<vmem>>, vector<2x32xf32>,
    %c14 = arith.constant 14 : index
    %c0_76 = arith.constant 0 : index
    %302 = vector.load %arg10[%c14, %c0_76] : memref<16x128xf32, #tpu.memory_space<vmem>>, vector<2x128xf32>
    %cst_77 = arith.constant dense<0.000000e+00> : vector<2x128xf32>
    %303 = tpu.matmul %279, %7, %cst_77 {dimension_numbers = #tpu.dot_dimension_numbers<[1], [0], [0], [1], [0, 0, 1, 1], [], []>} : vector<2x32xf32>, vector<32x128xf32>, vector<2x128xf32> -> vector<2x128xf32>
    %304 = arith.addf %302, %303 : vector<2x128xf32>
    %305 = vector.extract_strided_slice %304 {offsets = [0, 0], sizes = [2, 96], strides = [1, 1]} : vector<2x128xf32> to vector<2x96xf32>
    %306 = arith.negf %305 : vector<2x96xf32>
    %307 = math.exp %306 : vector<2x96xf32>
    %cst_78 = arith.constant 1.000000e+00 : f32
    %308 = vector.broadcast %cst_78 : f32 to vector<2x96xf32>
    %309 = arith.addf %308, %307 : vector<2x96xf32>
    %310 = arith.divf %308, %309 : vector<2x96xf32>
    %311 = vector.extract_strided_slice %304 {offsets = [0, 96], sizes = [2, 32], strides = [1, 1]} : vector<2x128xf32> to vector<2x32xf32>
    %312 = math.tanh %311 : vector<2x32xf32>
    %313 = vector.extract_strided_slice %310 {offsets = [0, 0], sizes = [2, 32], strides = [1, 1]} : vector<2x96xf32> to vector<2x32xf32>
    %314 = vector.extract_strided_slice %310 {offsets = [0, 32], sizes = [2, 32], strides = [1, 1]} : vector<2x96xf32> to vector<2x32xf32>
    %315 = vector.extract_strided_slice %310 {offsets = [0, 64], sizes = [2, 32], strides = [1, 1]} : vector<2x96xf32> to vector<2x32xf32>
    %316 = arith.mulf %314, %277 : vector<2x32xf32>
    %317 = arith.mulf %313, %312 : vector<2x32xf32>
    %318 = arith.addf %316, %317 : vector<2x32xf32>
    %319 = math.tanh %318 : vector<2x32xf32>
    %320 = arith.mulf %315, %319 : vector<2x32xf32>
    %cst_79 = arith.constant dense<0.000000e+00> : vector<2x128xf32>
    %321 = tpu.matmul %320, %9, %cst_79 {dimension_numbers = #tpu.dot_dimension_numbers<[1], [0], [0], [1], [0, 0, 1, 1], [], []>} : vector<2x32xf32>, vector<32x128xf32>, vector<2x128xf32> -> vector<2x128xf32>
    %322 = vector.broadcast %10 : vector<1x128xf32> to vector<2x128xf32>
    %323 = arith.addf %322, %321 : vector<2x128xf32>
    %cst_80 = arith.constant dense<0.000000e+00> : vector<2x128xf32>
    %324 = tpu.matmul %300, %8, %cst_80 {dimension_numbers = #tpu.dot_dimension_numbers<[1], [0], [0], [1], [0, 0, 1, 1], [], []>} : vector<2x32xf32>, vector<32x128xf32>, vector<2x128xf32> -> vector<2x128xf32>
    %325 = arith.addf %323, %324 : vector<2x128xf32>
    %326 = vector.extract_strided_slice %325 {offsets = [0, 0], sizes = [2, 96], strides = [1, 1]} : vector<2x128xf32> to vector<2x96xf32>
    %327 = arith.negf %326 : vector<2x96xf32>
    %328 = math.exp %327 : vector<2x96xf32>
    %cst_81 = arith.constant 1.000000e+00 : f32
    %329 = vector.broadcast %cst_81 : f32 to vector<2x96xf32>
    %330 = arith.addf %329, %328 : vector<2x96xf32>
    %331 = arith.divf %329, %330 : vector<2x96xf32>
    %332 = vector.extract_strided_slice %325 {offsets = [0, 96], sizes = [2, 32], strides = [1, 1]} : vector<2x128xf32> to vector<2x32xf32>
    %333 = math.tanh %332 : vector<2x32xf32>
    %334 = vector.extract_strided_slice %331 {offsets = [0, 0], sizes = [2, 32], strides = [1, 1]} : vector<2x96xf32> to vector<2x32xf32>
    %335 = vector.extract_strided_slice %331 {offsets = [0, 32], sizes = [2, 32], strides = [1, 1]} : vector<2x96xf32> to vector<2x32xf32>
    %336 = vector.extract_strided_slice %331 {offsets = [0, 64], sizes = [2, 32], strides = [1, 1]} : vector<2x96xf32> to vector<2x32xf32>
    %337 = arith.mulf %335, %298 : vector<2x32xf32>
    %338 = arith.mulf %334, %333 : vector<2x32xf32>
    %339 = arith.addf %337, %338 : vector<2x32xf32>
    %340 = math.tanh %339 : vector<2x32xf32>
    %341 = arith.mulf %336, %340 : vector<2x32xf32>
    %c14_82 = arith.constant 14 : index
    %c0_83 = arith.constant 0 : index
    %342 = vector.load %arg11[%c14_82, %c0_83] : memref<16x32xf32, #tpu.memory_space<vmem>>, vector<2x32xf32>
    tpu.vector_store %arg11[%c14_82, %c0_83], %341 {strides = array<i32>} : memref<16x32xf32, #tpu.memory_space<vmem>>, vector<2x32xf32>,
    %c0_84 = arith.constant 0 : index
    %c0_85 = arith.constant 0 : index
    %343 = vector.load %arg11[%c0_84, %c0_85] : memref<16x32xf32, #tpu.memory_space<vmem>>, vector<16x32xf32>
    %c0_86 = arith.constant 0 : index
    %c0_87 = arith.constant 0 : index
    %344 = vector.load %arg7[%c0_86, %c0_87] : memref<32x8xf32, #tpu.memory_space<vmem>>, vector<32x8xf32>
    %cst_88 = arith.constant dense<0.000000e+00> : vector<16x8xf32>
    %345 = tpu.matmul %343, %344, %cst_88 {dimension_numbers = #tpu.dot_dimension_numbers<[1], [0], [0], [1], [0, 0, 1, 1], [], []>} : vector<16x32xf32>, vector<32x8xf32>, vector<16x8xf32> -> vector<16x8xf32>
    %c0_89 = arith.constant 0 : index
    %c0_90 = arith.constant 0 : index
    %346 = vector.load %arg8[%c0_89, %c0_90] : memref<1x8xf32, #tpu.memory_space<vmem>>, vector<1x8xf32>
    %347 = vector.broadcast %346 : vector<1x8xf32> to vector<16x8xf32>
    %348 = arith.addf %345, %347 : vector<16x8xf32>
    %c0_91 = arith.constant 0 : index
    %c0_92 = arith.constant 0 : index
    %349 = vector.load %arg9[%c0_91, %c0_92] : memref<16x8xf32, #tpu.memory_space<vmem>>, vector<16x8xf32>
    tpu.vector_store %arg9[%c0_91, %c0_92], %348 {strides = array<i32>} : memref<16x8xf32, #tpu.memory_space<vmem>>, vector<16x8xf32>,
    return
  }
}

</mosaic_0001>

<bundles_post_ra>
// kernel: lstm_model_forward.1
= control target key start
LH: loop header
LB: loop body
LE: loop exit
PB: predicated region body
PF: predicated region fallthrough
CT: control target
= control target key end

     0   :  { %14 = vsyncpa [#allocation5], 0  ;;  %s2021_s0 = inlined_call_operand.vmem [shape: f32[16,16], index: 0, kind: input, shape index: {}]   ;;  %s2022_s1 = inlined_call_operand.hbm [shape: f32[16,128], index: 1, kind: input, shape index: {}]   ;;  %s2023_s2 = inlined_call_operand.vmem [shape: f32[32,128], index: 2, kind: input, shape index: {}]   ;;  %s2024_s3 = inlined_call_operand.vmem [shape: f32[1,128], index: 3, kind: input, shape index: {}]   ;;  %s2025_s4 = inlined_call_operand.vmem [shape: f32[32,128], index: 4, kind: input, shape index: {}]   ;;  %s2026_s5 = inlined_call_operand.hbm [shape: f32[32,128], index: 5, kind: input, shape index: {}]   ;;  %s2027_s6 = inlined_call_operand.vmem [shape: f32[1,128], index: 6, kind: input, shape index: {}]   ;;  %s2028_s7 = inlined_call_operand.vmem [shape: f32[32,8], index: 7, kind: input, shape index: {}]   ;;  %s2029_s8 = inlined_call_operand.vmem [shape: f32[1,8], index: 8, kind: input, shape index: {}]   ;;  %s2030_s9 = inlined_call_operand.vmem [shape: f32[16,8], index: 9, kind: output, shape index: {}]  }
   0x1   :  { %s22_s11 = sshll.u32 %s2022_s1, 4  ;;  %s23_s11 = int_to_ptr.hbm [resolvable:$true] %s22_s11 }
   0x2   :  { %15 = vsyncpa [#allocation7], 0  ;;  %s1604_s12 = smov [#allocation4]   ;;  %s41_s16 = sshll.u32 %s2026_s5, 4  ;;  %s42_s16 = int_to_ptr.hbm [resolvable:$true] %s41_s16 }
   0x3   :  { %s24_s13 = sshll.u32 %s1604_s12, 4  ;;  %s1605_s17 = smov 128   ;;  %s25_s13 = int_to_ptr.vmem [resolvable:$true] %s24_s13 }
   0x4   :  { %s1606_s18 = smov 8   ;;  %s1607_s19 = smov [#allocation6]  }
   0x5   :  { %30 = dma.hbm_to_vmem [thread:$0]  %s23_s11, 256, %s25_s13, [#allocation5], %s1605_s17, %s1605_s17, %s1606_s18  }
   0x6   :  { %s43_s20 = sshll.u32 %s1607_s19, 4  ;;  %s44_s20 = int_to_ptr.vmem [resolvable:$true] %s43_s20 }
   0x7   :  { %49 = dma.hbm_to_vmem [thread:$0]  %s42_s16, 512, %s44_s20, [#allocation7], %s1605_s17, %s1605_s17, %s1606_s18  }
   0x8   :  { %1600 = dma.done.wait [#allocation5], 256  }
   0x9   :  { %1601 = vsyncadd [#allocation5], 4294967040 }
   0xa   :  { %1602 = dma.done.wait [#allocation7], 512  }
   0xb   :  { %1603 = vsyncadd [#allocation7], 4294966784  ;;  %v67_v0 = vld [vmem:[#allocation4 + $0x8] sm:$0xff]  ;;  %v66_v1 = vld [vmem:[#allocation4] sm:$0xff]  ;;  %vm72_vm0 = vcmask 130048   ;;  %v1608_v7 = vmov 0.0  }
   0xc   :  { %93 = vmatpush.msra.mxu0 %v67_v0  ;;  %v64_v2 = vld [vmem:[%s2021_s0] sm:$0xff]  ;;  %v1673_v3 = vld [vmem:[%s2023_s2 + $0x18] sm:$0xff]  ;;  %v1678_v4 = vld [vmem:[%s2023_s2 + $0x10] sm:$0xff]  ;;  %s1609_s30 = smov 32   ;;  %vm118_vm5 = vcmask 261120   ;;  %vm271_vm14 = vcmask 254976  }
   0xd   :  { %134 = vmatpush.msra.mxu1 %v1673_v3  ;;  %v1684_v5 = vld [vmem:[%s2023_s2 + $0x8] sm:$0xff]  ;;  %v1691_v6 = vld [vmem:[%s2023_s2] sm:$0xff]  ;;  %v1719_v34 = vld [vmem:[%s2025_s4 + $0x18] sm:$0xff] }
   0xe   :  { %94 = vmatpush.msra.mxu0 %v66_v1  ;;  %v1707_v8 = vld [vmem:[%s2024_s3] ss:$0 sm:$0xff]  ;;  %v1724_v35 = vld [vmem:[%s2025_s4 + $0x10] sm:$0xff]  ;;  %197 = vmatpush.msra.mxu3 %v1719_v34  ;;  %v1731_v36 = vld [vmem:[%s2025_s4 + $0x8] sm:$0xff] }
   0xf   :  { %1371 = vmatmul.msk.f32.vlgmr.msra.gmra.mxu0 %vm72_vm0, %v64_v2  ;;  %135 = vmatpush.msra.mxu1 %v1678_v4  ;;  %v1740_v37 = vld [vmem:[%s2025_s4] sm:$0xff]  ;;  %s1610_s4 = smov 64   ;;  %v1753_v40 = vld [vmem:[#allocation6 + $0x18] sm:$0xff]  ;;  %v1759_v42 = vld [vmem:[#allocation6 + $0x8] sm:$0xff] }
  0x10   :  { %436 = vmatpush.msrb.mxu0 %v1673_v3  ;;  %349 = vmatpush.msra.mxu2 %v1719_v34  ;;  %v1755_v41 = vld [vmem:[#allocation6 + $0x10] sm:$0xff]  ;;  %v1763_v43 = vld [vmem:[#allocation6] sm:$0xff] }
  0x11   :  { %136 = vmatpush.msra.mxu1 %v1684_v5  ;;  %198 = vmatpush.msra.mxu3 %v1724_v35  ;;  %v1787_v50 = vld [vmem:[%s2027_s6] ss:$0 sm:$0xff] }
  0x12   :  { %437 = vmatpush.msrb.mxu0 %v1678_v4  ;;  %350 = vmatpush.msra.mxu2 %v1724_v35 }
  0x13   :  { %137 = vmatpush.msra.mxu1 %v1691_v6  ;;  %199 = vmatpush.msra.mxu3 %v1731_v36 }
  0x14   :  { %138 = vmatmul.f32.vlgmr.msra.gmra.mxu1 %v1608_v7  ;;  %438 = vmatpush.msrb.mxu0 %v1684_v5 }
  0x15   :  { %286 = vmatpush.msrb.mxu1 %v1673_v3  ;;  %351 = vmatpush.msra.mxu2 %v1731_v36 }
  0x16   :  { %439 = vmatpush.msrb.mxu0 %v1691_v6  ;;  %200 = vmatpush.msra.mxu3 %v1740_v37 }
  0x17   :  { %287 = vmatpush.msrb.mxu1 %v1678_v4  ;;  %352 = vmatpush.msra.mxu2 %v1740_v37 }
  0x18   :  { %649 = vmatpush.msra.mxu0 %v1719_v34  ;;  %221 = vmatpush.msrb.mxu3 %v1753_v40 }
  0x19   :  { %288 = vmatpush.msrb.mxu1 %v1684_v5  ;;  %522 = vmatpush.msrb.mxu2 %v1753_v40 }
  0x1a   :  { %650 = vmatpush.msra.mxu0 %v1724_v35  ;;  %222 = vmatpush.msrb.mxu3 %v1755_v41 }
  0x1b   :  { %289 = vmatpush.msrb.mxu1 %v1691_v6  ;;  %523 = vmatpush.msrb.mxu2 %v1755_v41 }
  0x1c   :  { %651 = vmatpush.msra.mxu0 %v1731_v36  ;;  %223 = vmatpush.msrb.mxu3 %v1759_v42 }
  0x1d   :  { %499 = vmatpush.msra.mxu1 %v1719_v34  ;;  %524 = vmatpush.msrb.mxu2 %v1759_v42 }
  0x1e   :  { %652 = vmatpush.msra.mxu0 %v1740_v37  ;;  %224 = vmatpush.msrb.mxu3 %v1763_v43 }
  0x1f   :  { %500 = vmatpush.msra.mxu1 %v1724_v35  ;;  %525 = vmatpush.msrb.mxu2 %v1763_v43 }
  0x21   :  { %501 = vmatpush.msra.mxu1 %v1731_v36 }
  0x23   :  { %502 = vmatpush.msra.mxu1 %v1740_v37 }
  0x8c   :  { %v96_v9 = vpop.f32.mrf.mxu0 }
  0x8d   :  { %v97_v10 = vadd.f32 %v1707_v8, %v96_v9 }
  0x8f   :  { %102 = vst [vmem:[#allocation2] sm:$0xff] %v97_v10 }
  0x91   :  { %v139_v11 = vpop.f32.mrf.mxu1 }
  0x96   :  { %v117_v12 = vld [vmem:[#allocation2] sm:$0x3]  ;;  %v273_v45 = vld [vmem:[#allocation2 + $0x2] sm:$0x3] }
  0x97   :  { %v142_v13 = vadd.f32 %v139_v11, %v117_v12 }
  0x99   :  { %1423 = vtanh.f32 %v142_v13  ;;  %v1373_v15 = vmul.f32 -1.442695, %v142_v13 }
  0x9b   :  { %1425 = vpow2.f32 %v1373_v15 }
  0x9f   :  { %v1424_v14 = vpop.eup %1423 }
  0xa0   :  { %165 = vrot.lane.b32.xlu0 %v1424_v14, %s1609_s30 }
  0xa1   :  { %v1426_v16 = vpop.eup %1425 }
  0xa2   :  { %v146_v17 = vadd.f32 1.0, %v1426_v16 }
  0xa4   :  { %1427 = vrcp.f32 %v146_v17  ;;  %v158_v23 = vand.u32 2147483648, %v146_v17  ;;  %vm152_vm2 = vweird.f32 %v146_v17  ;;  %v156_v24 = vand.u32 2147483647, %v146_v17 }
  0xa6   :  { %v159_v26 = vor.u32 1.1754944e-38, %v158_v23  ;;  %vm157_vm4 = vcmp.eq.f32.partialorder %v156_v24, 8.507059e+37 }
  0xaa   :  { %v1428_v18 = vpop.eup %1427 }
  0xab   :  { %v148_v19 = vmul.f32 %v1428_v18, %v146_v17  ;;  %vm153_vm1 = vweird.f32 %v1428_v18 }
  0xac   :  { %vm154_vm3 = vmor %vm152_vm2, %vm153_vm1 }
  0xad   :  { %v149_v20 = vsub.f32 1.0, %v148_v19 }
  0xaf   :  { %v150_v21 = vmul.f32 %v1428_v18, %v149_v20 }
  0xb1   :  { %v151_v22 = vadd.f32 %v1428_v18, %v150_v21 }
  0xb3   :  { %v155_v25 = vsel %vm154_vm3, %v1428_v18, %v151_v22 }
  0xb4   :  { %v160_v28 = vsel %vm157_vm4, %v159_v26, %v155_v25 }
  0xb5   :  { %v163_v30 = vmul.f32 0.0, %v160_v28 }
 0x112   :  { %v166_v27 = vpop.permute.xlu0 %165 }
 0x113   :  { %v168_v29 = vmul.f32 %v166_v27, %v160_v28 }
 0x115   :  { %170 = vrot.lane.b32.xlu0 %v168_v29, %s1609_s30 }
 0x187   :  { %v171_v31 = vpop.permute.xlu0 %170 }
 0x188   :  { %v1712_v32 = vadd.f32 %v171_v31, %v163_v30 }
 0x18a   :  { %1429 = vtanh.f32 %v1712_v32 }
 0x190   :  { %v1430_v33 = vpop.eup %1429 }
 0x191   :  { %176 = vrot.lane.b32.xlu1 %v1430_v33, %s1609_s30 }
 0x203   :  { %v177_v38 = vpop.permute.xlu1 %176 }
 0x204   :  { %v179_v39 = vmul.f32 %v177_v38, %v160_v28 }
 0x206   :  { %181 = vrot.lane.b32.xlu1 %v179_v39, %s1610_s4 }
 0x278   :  { %v182_v44 = vpop.permute.xlu1 %181 }
 0x279   :  { %1374 = vmatmul.msk.f32.vlgmr.msra.gmra.mxu3 %vm118_vm5, %v182_v44  ;;  %1376 = vmatmul.msk.f32.vlgmr.msrb.gmra.mxu1 %vm118_vm5, %v182_v44 }
 0x27a   :  { %372 = vmatpush.msra.mxu3 %v1753_v40  ;;  %672 = vmatpush.msrb.mxu1 %v1753_v40 }
 0x27c   :  { %373 = vmatpush.msra.mxu3 %v1755_v41  ;;  %673 = vmatpush.msrb.mxu1 %v1755_v41 }
 0x27e   :  { %374 = vmatpush.msra.mxu3 %v1759_v42  ;;  %674 = vmatpush.msrb.mxu1 %v1759_v42 }
 0x280   :  { %375 = vmatpush.msra.mxu3 %v1763_v43  ;;  %675 = vmatpush.msrb.mxu1 %v1763_v43 }
 0x281   :  { %225 = vmatmul.f32.vlgmr.msrb.gmra.mxu3 %v1608_v7 }
 0x282   :  { %586 = vmatpush.msrb.mxu3 %v1673_v3 }
 0x284   :  { %587 = vmatpush.msrb.mxu3 %v1678_v4 }
 0x286   :  { %588 = vmatpush.msrb.mxu3 %v1684_v5 }
 0x288   :  { %589 = vmatpush.msrb.mxu3 %v1691_v6 }
 0x2f6   :  { %v291_v46 = vpop.f32.mrf.mxu1 }
 0x2f7   :  { %v294_v47 = vadd.f32 %v291_v46, %v273_v45 }
 0x2f9   :  { %1431 = vtanh.f32 %v294_v47  ;;  %v1377_v55 = vmul.f32 -1.442695, %v294_v47 }
 0x2fc   :  { %v202_v48 = vpop.f32.mrf.mxu3 }
 0x2fd   :  { %v208_v51 = vadd.f32 %v1787_v50, %v202_v48 }
 0x2ff   :  { %v1432_v49 = vpop.eup %1431 }
 0x300   :  { %317 = vrot.lane.b32.xlu2 %v1432_v49, %s1609_s30 }
 0x304   :  { %v226_v52 = vpop.f32.mrf.mxu3 }
 0x305   :  { %v229_v53 = vadd.f32 %v226_v52, %v208_v51  ;;  %v423_v52 = vld [vmem:[#allocation2 + $0x4] sm:$0x3] }
 0x307   :  { %1433 = vtanh.f32 %v229_v53  ;;  %v1375_v58 = vmul.f32 -1.442695, %v229_v53 }
 0x308   :  { %1435 = vpow2.f32 %v1377_v55 }
 0x30d   :  { %v1434_v54 = vpop.eup %1433 }
 0x30e   :  { %252 = vrot.lane.b32.xlu2 %v1434_v54, %s1609_s30  ;;  %v1436_v56 = vpop.eup %1435 }
 0x30f   :  { %v298_v57 = vadd.f32 1.0, %v1436_v56 }
 0x311   :  { %1437 = vrcp.f32 %v298_v57  ;;  %v310_v7 = vand.u32 2147483648, %v298_v57  ;;  %vm304_vm7 = vweird.f32 %v298_v57  ;;  %v308_v9 = vand.u32 2147483647, %v298_v57 }
 0x312   :  { %1439 = vpow2.f32 %v1375_v58 }
 0x313   :  { %v311_v12 = vor.u32 1.1754944e-38, %v310_v7  ;;  %vm309_vm9 = vcmp.eq.f32.partialorder %v308_v9, 8.507059e+37 }
 0x317   :  { %v1438_v59 = vpop.eup %1437 }
 0x318   :  { %v1440_v60 = vpop.eup %1439  ;;  %v300_v61 = vmul.f32 %v1438_v59, %v298_v57  ;;  %vm305_vm6 = vweird.f32 %v1438_v59 }
 0x319   :  { %v233_v62 = vadd.f32 1.0, %v1440_v60  ;;  %vm306_vm8 = vmor %vm304_vm7, %vm305_vm6 }
 0x31a   :  { %v301_v63 = vsub.f32 1.0, %v300_v61 }
 0x31b   :  { %1441 = vrcp.f32 %v233_v62  ;;  %v245_v19 = vand.u32 2147483648, %v233_v62  ;;  %vm239_vm11 = vweird.f32 %v233_v62  ;;  %v243_v20 = vand.u32 2147483647, %v233_v62 }
 0x31c   :  { %v302_v0 = vmul.f32 %v1438_v59, %v301_v63 }
 0x31d   :  { %v246_v22 = vor.u32 1.1754944e-38, %v245_v19  ;;  %vm244_vm13 = vcmp.eq.f32.partialorder %v243_v20, 8.507059e+37 }
 0x31e   :  { %v303_v2 = vadd.f32 %v1438_v59, %v302_v0 }
 0x320   :  { %v307_v11 = vsel %vm306_vm8, %v1438_v59, %v303_v2 }
 0x321   :  { %v1442_v1 = vpop.eup %1441  ;;  %v312_v15 = vsel %vm309_vm9, %v311_v12, %v307_v11 }
 0x322   :  { %v235_v10 = vmul.f32 %v1442_v1, %v233_v62  ;;  %vm240_vm10 = vweird.f32 %v1442_v1  ;;  %v315_v26 = vmul.f32 %v312_v15, %v1712_v32  ;;  %v65_v32 = vld [vmem:[%s2021_s0 + $0x8] sm:$0xff] }
 0x323   :  { %vm241_vm12 = vmor %vm239_vm11, %vm240_vm10  ;;  %1372 = vmatmul.msk.f32.gmra.mxu0 %vm72_vm0, %v65_v32 }
 0x324   :  { %v236_v13 = vsub.f32 1.0, %v235_v10 }
 0x326   :  { %v237_v17 = vmul.f32 %v1442_v1, %v236_v13 }
 0x328   :  { %v238_v18 = vadd.f32 %v1442_v1, %v237_v17 }
 0x32a   :  { %v242_v21 = vsel %vm241_vm12, %v1442_v1, %v238_v18 }
 0x32b   :  { %v247_v24 = vsel %vm244_vm13, %v246_v22, %v242_v21 }
 0x32c   :  { %v250_v30 = vmul.f32 0.0, %v247_v24 }
 0x35a   :  { %v318_v14 = vpop.permute.xlu2 %317 }
 0x35b   :  { %v320_v16 = vmul.f32 %v318_v14, %v312_v15 }
 0x35d   :  { %322 = vrot.lane.b32.xlu0 %v320_v16, %s1609_s30 }
 0x368   :  { %v253_v23 = vpop.permute.xlu2 %252 }
 0x369   :  { %v255_v25 = vmul.f32 %v253_v23, %v247_v24 }
 0x36b   :  { %257 = vrot.lane.b32.xlu1 %v255_v25, %s1609_s30 }
 0x3a0   :  { %v99_v49 = vpop.f32.mrf.mxu0 }
 0x3a1   :  { %v100_v51 = vadd.f32 %v1707_v8, %v99_v49 }
 0x3a3   :  { %103 = vst [vmem:[#allocation2 + $0x8] sm:$0xff] %v100_v51 }
 0x3cf   :  { %v323_v27 = vpop.permute.xlu0 %322 }
 0x3d0   :  { %v1795_v28 = vadd.f32 %v323_v27, %v315_v26 }
 0x3d2   :  { %1443 = vtanh.f32 %v1795_v28 }
 0x3d8   :  { %v1444_v29 = vpop.eup %1443 }
 0x3d9   :  { %328 = vrot.lane.b32.xlu2 %v1444_v29, %s1609_s30 }
 0x3dd   :  { %v258_v31 = vpop.permute.xlu1 %257 }
 0x3de   :  { %v1799_v33 = vadd.f32 %v258_v31, %v250_v30 }
 0x3e0   :  { %1445 = vtanh.f32 %v1799_v33 }
 0x3e6   :  { %v1446_v38 = vpop.eup %1445 }
 0x3e7   :  { %263 = vrot.lane.b32.xlu0 %v1446_v38, %s1609_s30 }
 0x433   :  { %v329_v39 = vpop.permute.xlu2 %328 }
 0x434   :  { %v331_v44 = vmul.f32 %v329_v39, %v312_v15 }
 0x436   :  { %333 = vrot.lane.b32.xlu1 %v331_v44, %s1610_s4 }
 0x459   :  { %v264_v45 = vpop.permute.xlu0 %263 }
 0x45a   :  { %v266_v46 = vmul.f32 %v264_v45, %v247_v24 }
 0x45c   :  { %268 = vrot.lane.b32.xlu2 %v266_v46, %s1610_s4 }
 0x4a8   :  { %v334_v47 = vpop.permute.xlu1 %333 }
 0x4a9   :  { %1378 = vmatmul.msk.f32.vlgmr.msra.gmra.mxu2 %vm118_vm5, %v334_v47  ;;  %1381 = vmatmul.msk.f32.vlgmr.msrb.gmra.mxu0 %vm118_vm5, %v334_v47 }
 0x4aa   :  { %736 = vmatpush.msra.mxu2 %v1673_v3  ;;  %822 = vmatpush.msrb.mxu0 %v1753_v40 }
 0x4ac   :  { %737 = vmatpush.msra.mxu2 %v1678_v4  ;;  %823 = vmatpush.msrb.mxu0 %v1755_v41 }
 0x4ae   :  { %738 = vmatpush.msra.mxu2 %v1684_v5  ;;  %824 = vmatpush.msrb.mxu0 %v1759_v42 }
 0x4b0   :  { %739 = vmatpush.msra.mxu2 %v1691_v6  ;;  %825 = vmatpush.msrb.mxu0 %v1763_v43 }
 0x4b6   :  { %v269_v48 = vpop.permute.xlu2 %268 }
 0x4b7   :  { %272 = vst.msk [vmem:[#allocation3] sm:$0x3] %vm271_vm14, %v269_v48  ;;  %1379 = vmatmul.msk.f32.vlgmr.msra.gmra.mxu3 %vm118_vm5, %v269_v48 }
 0x4b8   :  { %799 = vmatpush.msra.mxu3 %v1719_v34 }
 0x4ba   :  { %800 = vmatpush.msra.mxu3 %v1724_v35 }
 0x4bc   :  { %801 = vmatpush.msra.mxu3 %v1731_v36 }
 0x4be   :  { %802 = vmatpush.msra.mxu3 %v1740_v37 }
 0x526   :  { %v441_v53 = vpop.f32.mrf.mxu0 }
 0x527   :  { %v444_v54 = vadd.f32 %v441_v53, %v423_v52 }
 0x529   :  { %1447 = vtanh.f32 %v444_v54  ;;  %v1382_v8 = vmul.f32 -1.442695, %v444_v54  ;;  %v573_v54 = vld [vmem:[#allocation2 + $0x6] sm:$0x3] }
 0x52c   :  { %v354_v56 = vpop.f32.mrf.mxu2 }
 0x52d   :  { %v357_v57 = vadd.f32 %v1787_v50, %v354_v56 }
 0x52f   :  { %v1448_v55 = vpop.eup %1447 }
 0x530   :  { %467 = vrot.lane.b32.xlu0 %v1448_v55, %s1609_s30 }
 0x53a   :  { %v377_v58 = vpop.f32.mrf.mxu3 }
 0x53b   :  { %v380_v59 = vadd.f32 %v377_v58, %v357_v57 }
 0x53d   :  { %1449 = vtanh.f32 %v380_v59  ;;  %v1380_v63 = vmul.f32 -1.442695, %v380_v59 }
 0x53e   :  { %1451 = vpow2.f32 %v1382_v8 }
 0x543   :  { %v1450_v60 = vpop.eup %1449 }
 0x544   :  { %403 = vrot.lane.b32.xlu1 %v1450_v60, %s1609_s30  ;;  %v1452_v61 = vpop.eup %1451 }
 0x545   :  { %v448_v62 = vadd.f32 1.0, %v1452_v61 }
 0x547   :  { %1453 = vrcp.f32 %v448_v62  ;;  %v460_v12 = vand.u32 2147483648, %v448_v62  ;;  %vm454_vm0 = vweird.f32 %v448_v62  ;;  %v458_v13 = vand.u32 2147483647, %v448_v62 }
 0x548   :  { %1455 = vpow2.f32 %v1380_v63 }
 0x549   :  { %v461_v16 = vor.u32 1.1754944e-38, %v460_v12  ;;  %vm459_vm2 = vcmp.eq.f32.partialorder %v458_v13, 8.507059e+37 }
 0x54d   :  { %v1454_v0 = vpop.eup %1453 }
 0x54e   :  { %v450_v1 = vmul.f32 %v1454_v0, %v448_v62  ;;  %v1456_v2 = vpop.eup %1455  ;;  %vm455_vm15 = vweird.f32 %v1454_v0 }
 0x54f   :  { %v384_v9 = vadd.f32 1.0, %v1456_v2  ;;  %vm456_vm1 = vmor %vm454_vm0, %vm455_vm15 }
 0x550   :  { %v451_v7 = vsub.f32 1.0, %v450_v1 }
 0x551   :  { %1457 = vrcp.f32 %v384_v9  ;;  %v396_v24 = vand.u32 2147483648, %v384_v9  ;;  %vm390_vm4 = vweird.f32 %v384_v9  ;;  %v394_v25 = vand.u32 2147483647, %v384_v9 }
 0x552   :  { %v452_v10 = vmul.f32 %v1454_v0, %v451_v7 }
 0x553   :  { %v397_v27 = vor.u32 1.1754944e-38, %v396_v24  ;;  %vm395_vm7 = vcmp.eq.f32.partialorder %v394_v25, 8.507059e+37 }
 0x554   :  { %v453_v11 = vadd.f32 %v1454_v0, %v452_v10 }
 0x556   :  { %v457_v14 = vsel %vm456_vm1, %v1454_v0, %v453_v11 }
 0x557   :  { %v1458_v15 = vpop.eup %1457  ;;  %v462_v17 = vsel %vm459_vm2, %v461_v16, %v457_v14 }
 0x558   :  { %v386_v20 = vmul.f32 %v1458_v15, %v384_v9  ;;  %vm391_vm3 = vweird.f32 %v1458_v15  ;;  %v465_v38 = vmul.f32 %v462_v17, %v1795_v28 }
 0x559   :  { %vm392_vm6 = vmor %vm390_vm4, %vm391_vm3 }
 0x55a   :  { %v387_v21 = vsub.f32 1.0, %v386_v20 }
 0x55c   :  { %v388_v22 = vmul.f32 %v1458_v15, %v387_v21 }
 0x55e   :  { %v389_v23 = vadd.f32 %v1458_v15, %v388_v22 }
 0x560   :  { %v393_v26 = vsel %vm392_vm6, %v1458_v15, %v389_v23 }
 0x561   :  { %v398_v30 = vsel %vm395_vm7, %v397_v27, %v393_v26 }
 0x562   :  { %v401_v45 = vmul.f32 %v398_v30, %v1799_v33 }
 0x5a2   :  { %v468_v18 = vpop.permute.xlu0 %467 }
 0x5a3   :  { %v470_v19 = vmul.f32 %v468_v18, %v462_v17 }
 0x5a5   :  { %472 = vrot.lane.b32.xlu2 %v470_v19, %s1609_s30 }
 0x5b6   :  { %v404_v29 = vpop.permute.xlu1 %403 }
 0x5b7   :  { %v406_v31 = vmul.f32 %v404_v29, %v398_v30 }
 0x5b9   :  { %408 = vrot.lane.b32.xlu0 %v406_v31, %s1609_s30 }
 0x5ff   :  { %v473_v39 = vpop.permute.xlu2 %472 }
 0x600   :  { %v1832_v44 = vadd.f32 %v473_v39, %v465_v38 }
 0x602   :  { %1459 = vtanh.f32 %v1832_v44 }
 0x608   :  { %v1460_v32 = vpop.eup %1459 }
 0x609   :  { %478 = vrot.lane.b32.xlu1 %v1460_v32, %s1609_s30 }
 0x62b   :  { %v409_v46 = vpop.permute.xlu0 %408 }
 0x62c   :  { %v1837_v47 = vadd.f32 %v409_v46, %v401_v45 }
 0x62e   :  { %1461 = vtanh.f32 %v1837_v47 }
 0x634   :  { %v1462_v48 = vpop.eup %1461 }
 0x635   :  { %414 = vrot.lane.b32.xlu2 %v1462_v48, %s1609_s30 }
 0x67b   :  { %v479_v49 = vpop.permute.xlu1 %478 }
 0x67c   :  { %v481_v28 = vmul.f32 %v479_v49, %v462_v17 }
 0x67e   :  { %483 = vrot.lane.b32.xlu0 %v481_v28, %s1610_s4 }
 0x68f   :  { %v415_v51 = vpop.permute.xlu2 %414 }
 0x690   :  { %v417_v52 = vmul.f32 %v415_v51, %v398_v30 }
 0x692   :  { %419 = vrot.lane.b32.xlu1 %v417_v52, %s1610_s4 }
 0x6f0   :  { %v484_v53 = vpop.permute.xlu0 %483 }
 0x6f1   :  { %1383 = vmatmul.msk.f32.vlgmr.msra.gmra.mxu1 %vm118_vm5, %v484_v53  ;;  %1386 = vmatmul.msk.f32.vlgmr.msrb.gmra.mxu3 %vm118_vm5, %v484_v53 }
 0x6f2   :  { %886 = vmatpush.msra.mxu1 %v1673_v3  ;;  %972 = vmatpush.msrb.mxu3 %v1753_v40 }
 0x6f4   :  { %887 = vmatpush.msra.mxu1 %v1678_v4  ;;  %973 = vmatpush.msrb.mxu3 %v1755_v41 }
 0x6f6   :  { %888 = vmatpush.msra.mxu1 %v1684_v5  ;;  %974 = vmatpush.msrb.mxu3 %v1759_v42 }
 0x6f8   :  { %889 = vmatpush.msra.mxu1 %v1691_v6  ;;  %975 = vmatpush.msrb.mxu3 %v1763_v43 }
 0x704   :  { %v420_v33 = vpop.permute.xlu1 %419 }
 0x705   :  { %422 = vst.msk [vmem:[#allocation3 + $0x2] sm:$0x3] %vm271_vm14, %v420_v33  ;;  %1384 = vmatmul.msk.f32.vlgmr.msrb.gmra.mxu2 %vm118_vm5, %v420_v33 }
 0x706   :  { %949 = vmatpush.msrb.mxu2 %v1719_v34 }
 0x708   :  { %950 = vmatpush.msrb.mxu2 %v1724_v35 }
 0x70a   :  { %951 = vmatpush.msrb.mxu2 %v1731_v36 }
 0x70c   :  { %952 = vmatpush.msrb.mxu2 %v1740_v37 }
 0x76e   :  { %v504_v58 = vpop.f32.mrf.mxu1 }
 0x76f   :  { %v507_v59 = vadd.f32 %v1787_v50, %v504_v58 }
 0x774   :  { %v591_v55 = vpop.f32.mrf.mxu3 }
 0x775   :  { %v594_v56 = vadd.f32 %v591_v55, %v573_v54 }
 0x777   :  { %1463 = vtanh.f32 %v594_v56  ;;  %v1387_v62 = vmul.f32 -1.442695, %v594_v56  ;;  %v723_v56 = vld [vmem:[#allocation2 + $0x8] sm:$0x3] }
 0x77d   :  { %v1464_v57 = vpop.eup %1463 }
 0x77e   :  { %617 = vrot.lane.b32.xlu2 %v1464_v57, %s1609_s30 }
 0x788   :  { %v527_v60 = vpop.f32.mrf.mxu2 }
 0x789   :  { %v530_v8 = vadd.f32 %v527_v60, %v507_v59 }
 0x78b   :  { %1465 = vtanh.f32 %v530_v8  ;;  %v1385_v15 = vmul.f32 -1.442695, %v530_v8 }
 0x78c   :  { %1467 = vpow2.f32 %v1387_v62 }
 0x791   :  { %v1466_v61 = vpop.eup %1465 }
 0x792   :  { %553 = vrot.lane.b32.xlu0 %v1466_v61, %s1609_s30  ;;  %v1468_v63 = vpop.eup %1467 }
 0x793   :  { %v598_v0 = vadd.f32 1.0, %v1468_v63 }
 0x795   :  { %1469 = vrcp.f32 %v598_v0  ;;  %v610_v11 = vand.u32 2147483648, %v598_v0  ;;  %vm604_vm9 = vweird.f32 %v598_v0  ;;  %v608_v12 = vand.u32 2147483647, %v598_v0 }
 0x796   :  { %1471 = vpow2.f32 %v1385_v15 }
 0x797   :  { %v611_v14 = vor.u32 1.1754944e-38, %v610_v11  ;;  %vm609_vm11 = vcmp.eq.f32.partialorder %v608_v12, 8.507059e+37 }
 0x79b   :  { %v1470_v1 = vpop.eup %1469 }
 0x79c   :  { %v600_v2 = vmul.f32 %v1470_v1, %v598_v0  ;;  %vm605_vm8 = vweird.f32 %v1470_v1  ;;  %v1472_v19 = vpop.eup %1471 }
 0x79d   :  { %vm606_vm10 = vmor %vm604_vm9, %vm605_vm8  ;;  %v534_v20 = vadd.f32 1.0, %v1472_v19 }
 0x79e   :  { %v601_v7 = vsub.f32 1.0, %v600_v2 }
 0x79f   :  { %1473 = vrcp.f32 %v534_v20  ;;  %v546_v26 = vand.u32 2147483648, %v534_v20  ;;  %vm540_vm13 = vweird.f32 %v534_v20  ;;  %v544_v27 = vand.u32 2147483647, %v534_v20 }
 0x7a0   :  { %v602_v9 = vmul.f32 %v1470_v1, %v601_v7 }
 0x7a1   :  { %v547_v30 = vor.u32 1.1754944e-38, %v546_v26  ;;  %vm545_vm0 = vcmp.eq.f32.partialorder %v544_v27, 8.507059e+37 }
 0x7a2   :  { %v603_v10 = vadd.f32 %v1470_v1, %v602_v9 }
 0x7a4   :  { %v607_v13 = vsel %vm606_vm10, %v1470_v1, %v603_v10 }
 0x7a5   :  { %v612_v17 = vsel %vm609_vm11, %v611_v14, %v607_v13  ;;  %v1474_v21 = vpop.eup %1473 }
 0x7a6   :  { %v536_v22 = vmul.f32 %v1474_v21, %v534_v20  ;;  %vm541_vm12 = vweird.f32 %v1474_v21  ;;  %v615_v32 = vmul.f32 %v612_v17, %v1832_v44 }
 0x7a7   :  { %vm542_vm15 = vmor %vm540_vm13, %vm541_vm12 }
 0x7a8   :  { %v537_v23 = vsub.f32 1.0, %v536_v22 }
 0x7aa   :  { %v538_v24 = vmul.f32 %v1474_v21, %v537_v23 }
 0x7ac   :  { %v539_v25 = vadd.f32 %v1474_v21, %v538_v24 }
 0x7ae   :  { %v543_v29 = vsel %vm542_vm15, %v1474_v21, %v539_v25 }
 0x7af   :  { %v548_v38 = vsel %vm545_vm0, %v547_v30, %v543_v29 }
 0x7b0   :  { %v551_v49 = vmul.f32 %v548_v38, %v1837_v47 }
 0x7d8   :  { %v618_v16 = vpop.permute.xlu2 %617 }
 0x7d9   :  { %v620_v18 = vmul.f32 %v618_v16, %v612_v17 }
 0x7db   :  { %622 = vrot.lane.b32.xlu1 %v620_v18, %s1609_s30 }
 0x804   :  { %v554_v31 = vpop.permute.xlu0 %553 }
 0x805   :  { %v556_v39 = vmul.f32 %v554_v31, %v548_v38 }
 0x807   :  { %558 = vrot.lane.b32.xlu2 %v556_v39, %s1609_s30 }
 0x84d   :  { %v623_v45 = vpop.permute.xlu1 %622 }
 0x84e   :  { %v1865_v46 = vadd.f32 %v623_v45, %v615_v32 }
 0x850   :  { %1475 = vtanh.f32 %v1865_v46 }
 0x856   :  { %v1476_v48 = vpop.eup %1475 }
 0x857   :  { %628 = vrot.lane.b32.xlu0 %v1476_v48, %s1609_s30 }
 0x861   :  { %v559_v28 = vpop.permute.xlu2 %558 }
 0x862   :  { %v1870_v51 = vadd.f32 %v559_v28, %v551_v49 }
 0x864   :  { %1477 = vtanh.f32 %v1870_v51 }
 0x86a   :  { %v1478_v52 = vpop.eup %1477 }
 0x86b   :  { %564 = vrot.lane.b32.xlu1 %v1478_v52, %s1609_s30 }
 0x8c9   :  { %v629_v53 = vpop.permute.xlu0 %628 }
 0x8ca   :  { %v631_v44 = vmul.f32 %v629_v53, %v612_v17 }
 0x8cc   :  { %633 = vrot.lane.b32.xlu2 %v631_v44, %s1610_s4 }
 0x8dd   :  { %v565_v33 = vpop.permute.xlu1 %564 }
 0x8de   :  { %v567_v54 = vmul.f32 %v565_v33, %v548_v38 }
 0x8e0   :  { %569 = vrot.lane.b32.xlu0 %v567_v54, %s1610_s4 }
 0x926   :  { %v634_v55 = vpop.permute.xlu2 %633 }
 0x927   :  { %1388 = vmatmul.msk.f32.vlgmr.msra.gmra.mxu0 %vm118_vm5, %v634_v55  ;;  %1391 = vmatmul.msk.f32.vlgmr.msra.gmra.mxu2 %vm118_vm5, %v634_v55 }
 0x928   :  { %1036 = vmatpush.msra.mxu0 %v1673_v3  ;;  %1122 = vmatpush.msra.mxu2 %v1753_v40 }
 0x92a   :  { %1037 = vmatpush.msra.mxu0 %v1678_v4  ;;  %1123 = vmatpush.msra.mxu2 %v1755_v41 }
 0x92c   :  { %1038 = vmatpush.msra.mxu0 %v1684_v5  ;;  %1124 = vmatpush.msra.mxu2 %v1759_v42 }
 0x92e   :  { %1039 = vmatpush.msra.mxu0 %v1691_v6  ;;  %1125 = vmatpush.msra.mxu2 %v1763_v43 }
 0x952   :  { %v570_v47 = vpop.permute.xlu0 %569 }
 0x953   :  { %572 = vst.msk [vmem:[#allocation3 + $0x4] sm:$0x3] %vm271_vm14, %v570_v47  ;;  %1389 = vmatmul.msk.f32.vlgmr.msrb.gmra.mxu1 %vm118_vm5, %v570_v47 }
 0x954   :  { %1099 = vmatpush.msrb.mxu1 %v1719_v34 }
 0x956   :  { %1100 = vmatpush.msrb.mxu1 %v1724_v35 }
 0x958   :  { %1101 = vmatpush.msrb.mxu1 %v1731_v36 }
 0x95a   :  { %1102 = vmatpush.msrb.mxu1 %v1740_v37 }
 0x9a4   :  { %v654_v60 = vpop.f32.mrf.mxu0 }
 0x9a5   :  { %v657_v8 = vadd.f32 %v1787_v50, %v654_v60 }
 0x9aa   :  { %v741_v57 = vpop.f32.mrf.mxu2 }
 0x9ab   :  { %v744_v58 = vadd.f32 %v741_v57, %v723_v56 }
 0x9ad   :  { %1479 = vtanh.f32 %v744_v58  ;;  %v1392_v0 = vmul.f32 -1.442695, %v744_v58 }
 0x9b3   :  { %v1480_v59 = vpop.eup %1479 }
 0x9b4   :  { %767 = vrot.lane.b32.xlu1 %v1480_v59, %s1609_s30 }
 0x9d0   :  { %v677_v61 = vpop.f32.mrf.mxu1 }
 0x9d1   :  { %v680_v62 = vadd.f32 %v677_v61, %v657_v8 }
 0x9d3   :  { %1481 = vtanh.f32 %v680_v62  ;;  %v1390_v7 = vmul.f32 -1.442695, %v680_v62 }
 0x9d4   :  { %1483 = vpow2.f32 %v1392_v0 }
 0x9d9   :  { %v1482_v63 = vpop.eup %1481 }
 0x9da   :  { %703 = vrot.lane.b32.xlu2 %v1482_v63, %s1609_s30  ;;  %v1484_v1 = vpop.eup %1483 }
 0x9db   :  { %v748_v2 = vadd.f32 1.0, %v1484_v1 }
 0x9dd   :  { %1485 = vrcp.f32 %v748_v2  ;;  %v760_v17 = vand.u32 2147483648, %v748_v2  ;;  %vm754_vm2 = vweird.f32 %v748_v2  ;;  %v758_v18 = vand.u32 2147483647, %v748_v2 }
 0x9de   :  { %1487 = vpow2.f32 %v1390_v7 }
 0x9df   :  { %v761_v21 = vor.u32 1.1754944e-38, %v760_v17  ;;  %vm759_vm4 = vcmp.eq.f32.partialorder %v758_v18, 8.507059e+37 }
 0x9e3   :  { %v1486_v9 = vpop.eup %1485 }
 0x9e4   :  { %v1488_v10 = vpop.eup %1487  ;;  %v750_v11 = vmul.f32 %v1486_v9, %v748_v2  ;;  %vm755_vm1 = vweird.f32 %v1486_v9 }
 0x9e5   :  { %v684_v12 = vadd.f32 1.0, %v1488_v10  ;;  %vm756_vm3 = vmor %vm754_vm2, %vm755_vm1 }
 0x9e6   :  { %v751_v13 = vsub.f32 1.0, %v750_v11 }
 0x9e7   :  { %1489 = vrcp.f32 %v684_v12  ;;  %v696_v29 = vand.u32 2147483648, %v684_v12  ;;  %vm690_vm7 = vweird.f32 %v684_v12  ;;  %v694_v30 = vand.u32 2147483647, %v684_v12 }
 0x9e8   :  { %v752_v14 = vmul.f32 %v1486_v9, %v751_v13 }
 0x9e9   :  { %v697_v38 = vor.u32 1.1754944e-38, %v696_v29  ;;  %vm695_vm9 = vcmp.eq.f32.partialorder %v694_v30, 8.507059e+37 }
 0x9ea   :  { %v753_v16 = vadd.f32 %v1486_v9, %v752_v14 }
 0x9ec   :  { %v757_v20 = vsel %vm756_vm3, %v1486_v9, %v753_v16 }
 0x9ed   :  { %v1490_v15 = vpop.eup %1489  ;;  %v762_v23 = vsel %vm759_vm4, %v761_v21, %v757_v20 }
 0x9ee   :  { %v686_v19 = vmul.f32 %v1490_v15, %v684_v12  ;;  %vm691_vm6 = vweird.f32 %v1490_v15  ;;  %v765_v48 = vmul.f32 %v762_v23, %v1865_v46 }
 0x9ef   :  { %vm692_vm8 = vmor %vm690_vm7, %vm691_vm6 }
 0x9f0   :  { %v687_v22 = vsub.f32 1.0, %v686_v19 }
 0x9f2   :  { %v688_v26 = vmul.f32 %v1490_v15, %v687_v22 }
 0x9f4   :  { %v689_v27 = vadd.f32 %v1490_v15, %v688_v26 }
 0x9f6   :  { %v693_v31 = vsel %vm692_vm8, %v1490_v15, %v689_v27 }
 0x9f7   :  { %v698_v32 = vsel %vm695_vm9, %v697_v38, %v693_v31 }
 0x9f8   :  { %v701_v53 = vmul.f32 %v698_v32, %v1870_v51 }
 0xa26   :  { %v768_v24 = vpop.permute.xlu1 %767 }
 0xa27   :  { %v770_v25 = vmul.f32 %v768_v24, %v762_v23 }
 0xa29   :  { %772 = vrot.lane.b32.xlu0 %v770_v25, %s1609_s30 }
 0xa34   :  { %v704_v39 = vpop.permute.xlu2 %703 }
 0xa35   :  { %v706_v45 = vmul.f32 %v704_v39, %v698_v32 }
 0xa37   :  { %708 = vrot.lane.b32.xlu1 %v706_v45, %s1609_s30 }
 0xa9b   :  { %v773_v49 = vpop.permute.xlu0 %772 }
 0xa9c   :  { %v1898_v28 = vadd.f32 %v773_v49, %v765_v48 }
 0xa9e   :  { %1491 = vtanh.f32 %v1898_v28 }
 0xaa4   :  { %v1492_v52 = vpop.eup %1491 }
 0xaa5   :  { %778 = vrot.lane.b32.xlu2 %v1492_v52, %s1609_s30 }
 0xaa9   :  { %v709_v44 = vpop.permute.xlu1 %708 }
 0xaaa   :  { %v1903_v33 = vadd.f32 %v709_v44, %v701_v53  ;;  %v1023_v53 = vld [vmem:[#allocation2 + $0xc] sm:$0x3] }
 0xaac   :  { %1493 = vtanh.f32 %v1903_v33 }
 0xab2   :  { %v1494_v54 = vpop.eup %1493 }
 0xab3   :  { %714 = vrot.lane.b32.xlu0 %v1494_v54, %s1609_s30 }
 0xaff   :  { %v779_v55 = vpop.permute.xlu2 %778 }
 0xb00   :  { %v781_v46 = vmul.f32 %v779_v55, %v762_v23 }
 0xb02   :  { %783 = vrot.lane.b32.xlu1 %v781_v46, %s1610_s4 }
 0xb25   :  { %v715_v47 = vpop.permute.xlu0 %714 }
 0xb26   :  { %v717_v56 = vmul.f32 %v715_v47, %v698_v32 }
 0xb28   :  { %719 = vrot.lane.b32.xlu2 %v717_v56, %s1610_s4 }
 0xb74   :  { %v784_v57 = vpop.permute.xlu1 %783 }
 0xb75   :  { %1393 = vmatmul.msk.f32.vlgmr.msra.gmra.mxu3 %vm118_vm5, %v784_v57  ;;  %1396 = vmatmul.msk.f32.vlgmr.msra.gmra.mxu1 %vm118_vm5, %v784_v57 }
 0xb76   :  { %1186 = vmatpush.msra.mxu3 %v1673_v3  ;;  %1272 = vmatpush.msra.mxu1 %v1753_v40  ;;  %v873_v3 = vld [vmem:[#allocation2 + $0xa] sm:$0x3] }
 0xb78   :  { %1187 = vmatpush.msra.mxu3 %v1678_v4  ;;  %1273 = vmatpush.msra.mxu1 %v1755_v41 }
 0xb7a   :  { %1188 = vmatpush.msra.mxu3 %v1684_v5  ;;  %1274 = vmatpush.msra.mxu1 %v1759_v42 }
 0xb7c   :  { %1189 = vmatpush.msra.mxu3 %v1691_v6  ;;  %1275 = vmatpush.msra.mxu1 %v1763_v43 }
 0xb82   :  { %v720_v51 = vpop.permute.xlu2 %719 }
 0xb83   :  { %722 = vst.msk [vmem:[#allocation3 + $0x6] sm:$0x3] %vm271_vm14, %v720_v51  ;;  %1394 = vmatmul.msk.f32.vlgmr.msrb.gmra.mxu0 %vm118_vm5, %v720_v51 }
 0xb84   :  { %1249 = vmatpush.msrb.mxu0 %v1719_v34 }
 0xb86   :  { %1250 = vmatpush.msrb.mxu0 %v1724_v35 }
 0xb88   :  { %1251 = vmatpush.msrb.mxu0 %v1731_v36 }
 0xb8a   :  { %1252 = vmatpush.msrb.mxu0 %v1740_v37 }
 0xbf2   :  { %v891_v4 = vpop.f32.mrf.mxu1 }
 0xbf3   :  { %v894_v5 = vadd.f32 %v891_v4, %v873_v3 }
 0xbf5   :  { %1495 = vtanh.f32 %v894_v5  ;;  %v1397_v35 = vmul.f32 -1.442695, %v894_v5 }
 0xbf8   :  { %v804_v40 = vpop.f32.mrf.mxu3 }
 0xbf9   :  { %v807_v41 = vadd.f32 %v1787_v50, %v804_v40 }
 0xbfb   :  { %v1496_v6 = vpop.eup %1495 }
 0xbfc   :  { %917 = vrot.lane.b32.xlu0 %v1496_v6, %s1609_s30 }
 0xc00   :  { %v827_v42 = vpop.f32.mrf.mxu0 }
 0xc01   :  { %v830_v43 = vadd.f32 %v827_v42, %v807_v41 }
 0xc03   :  { %1497 = vtanh.f32 %v830_v43  ;;  %v1395_v58 = vmul.f32 -1.442695, %v830_v43 }
 0xc04   :  { %1499 = vpow2.f32 %v1397_v35 }
 0xc09   :  { %v1498_v34 = vpop.eup %1497 }
 0xc0a   :  { %853 = vrot.lane.b32.xlu1 %v1498_v34, %s1609_s30  ;;  %v1500_v36 = vpop.eup %1499 }
 0xc0b   :  { %v898_v37 = vadd.f32 1.0, %v1500_v36 }
 0xc0d   :  { %1501 = vrcp.f32 %v898_v37  ;;  %v910_v2 = vand.u32 2147483648, %v898_v37  ;;  %vm904_vm11 = vweird.f32 %v898_v37  ;;  %v908_v7 = vand.u32 2147483647, %v898_v37 }
 0xc0e   :  { %1503 = vpow2.f32 %v1395_v58 }
 0xc0f   :  { %v911_v11 = vor.u32 1.1754944e-38, %v910_v2  ;;  %vm909_vm13 = vcmp.eq.f32.partialorder %v908_v7, 8.507059e+37 }
 0xc13   :  { %v1502_v59 = vpop.eup %1501 }
 0xc14   :  { %v1504_v60 = vpop.eup %1503  ;;  %v900_v8 = vmul.f32 %v1502_v59, %v898_v37  ;;  %vm905_vm10 = vweird.f32 %v1502_v59 }
 0xc15   :  { %v834_v61 = vadd.f32 1.0, %v1504_v60  ;;  %vm906_vm12 = vmor %vm904_vm11, %vm905_vm10 }
 0xc16   :  { %v901_v62 = vsub.f32 1.0, %v900_v8 }
 0xc17   :  { %1505 = vrcp.f32 %v834_v61  ;;  %v846_v18 = vand.u32 2147483648, %v834_v61  ;;  %vm840_vm0 = vweird.f32 %v834_v61  ;;  %v844_v19 = vand.u32 2147483647, %v834_v61 }
 0xc18   :  { %v902_v63 = vmul.f32 %v1502_v59, %v901_v62 }
 0xc19   :  { %v847_v21 = vor.u32 1.1754944e-38, %v846_v18  ;;  %vm845_vm2 = vcmp.eq.f32.partialorder %v844_v19, 8.507059e+37 }
 0xc1a   :  { %v903_v1 = vadd.f32 %v1502_v59, %v902_v63 }
 0xc1c   :  { %v907_v10 = vsel %vm906_vm12, %v1502_v59, %v903_v1  ;;  %vm1362_vm12 = vcmask 64512  }
 0xc1d   :  { %v1506_v0 = vpop.eup %1505  ;;  %v912_v14 = vsel %vm909_vm13, %v911_v11, %v907_v10 }
 0xc1e   :  { %v836_v9 = vmul.f32 %v1506_v0, %v834_v61  ;;  %vm841_vm15 = vweird.f32 %v1506_v0  ;;  %v915_v25 = vmul.f32 %v912_v14, %v1898_v28 }
 0xc1f   :  { %vm842_vm1 = vmor %vm840_vm0, %vm841_vm15 }
 0xc20   :  { %v837_v12 = vsub.f32 1.0, %v836_v9 }
 0xc22   :  { %v838_v16 = vmul.f32 %v1506_v0, %v837_v12 }
 0xc24   :  { %v839_v17 = vadd.f32 %v1506_v0, %v838_v16 }
 0xc26   :  { %v843_v20 = vsel %vm842_vm1, %v1506_v0, %v839_v17 }
 0xc27   :  { %v848_v23 = vsel %vm845_vm2, %v847_v21, %v843_v20 }
 0xc28   :  { %v851_v30 = vmul.f32 %v848_v23, %v1903_v33 }
 0xc6e   :  { %v918_v13 = vpop.permute.xlu0 %917 }
 0xc6f   :  { %v920_v15 = vmul.f32 %v918_v13, %v912_v14 }
 0xc71   :  { %922 = vrot.lane.b32.xlu2 %v920_v15, %s1609_s30 }
 0xc7c   :  { %v854_v22 = vpop.permute.xlu1 %853 }
 0xc7d   :  { %v856_v24 = vmul.f32 %v854_v22, %v848_v23 }
 0xc7f   :  { %858 = vrot.lane.b32.xlu0 %v856_v24, %s1609_s30 }
 0xccb   :  { %v923_v26 = vpop.permute.xlu2 %922 }
 0xccc   :  { %v1931_v27 = vadd.f32 %v923_v26, %v915_v25 }
 0xcce   :  { %1507 = vtanh.f32 %v1931_v27 }
 0xcd4   :  { %v1508_v29 = vpop.eup %1507 }
 0xcd5   :  { %928 = vrot.lane.b32.xlu1 %v1508_v29, %s1609_s30  ;;  %v1327_v29 = vld [vmem:[%s2028_s7 + $0x10] sm:$0xff] }
 0xcf1   :  { %v859_v31 = vpop.permute.xlu0 %858 }
 0xcf2   :  { %v1936_v38 = vadd.f32 %v859_v31, %v851_v30  ;;  %v1326_v30 = vld [vmem:[%s2028_s7 + $0x8] sm:$0xff]  ;;  %v1325_v31 = vld [vmem:[%s2028_s7] sm:$0xff] }
 0xcf4   :  { %1509 = vtanh.f32 %v1936_v38 }
 0xcfa   :  { %v1510_v39 = vpop.eup %1509 }
 0xcfb   :  { %864 = vrot.lane.b32.xlu2 %v1510_v39, %s1609_s30  ;;  %v1323_v39 = vld [vmem:[#allocation3] sm:$0xff] }
 0xd47   :  { %v929_v32 = vpop.permute.xlu1 %928 }
 0xd48   :  { %v931_v45 = vmul.f32 %v929_v32, %v912_v14  ;;  %v1173_v32 = vld [vmem:[#allocation2 + $0xe] sm:$0x3] }
 0xd4a   :  { %933 = vrot.lane.b32.xlu0 %v931_v45, %s1610_s4 }
 0xd55   :  { %v865_v48 = vpop.permute.xlu2 %864 }
 0xd56   :  { %v867_v49 = vmul.f32 %v865_v48, %v848_v23 }
 0xd58   :  { %869 = vrot.lane.b32.xlu1 %v867_v49, %s1610_s4 }
 0xdbc   :  { %v934_v28 = vpop.permute.xlu0 %933 }
 0xdbd   :  { %1398 = vmatmul.msk.f32.vlgmr.msrb.gmra.mxu2 %vm118_vm5, %v934_v28  ;;  %1401 = vmatmul.msk.f32.vlgmr.msra.gmra.mxu0 %vm118_vm5, %v934_v28 }
 0xdca   :  { %v870_v52 = vpop.permute.xlu1 %869 }
 0xdcb   :  { %872 = vst.msk [vmem:[#allocation3 + $0x8] sm:$0x3] %vm271_vm14, %v870_v52  ;;  %1399 = vmatmul.msk.f32.vlgmr.msrb.gmra.mxu3 %vm118_vm5, %v870_v52  ;;  %v1984_v52 = vld [vmem:[%s2027_s6] ss:$0 sm:$0xff] }
 0xe3a   :  { %v1041_v44 = vpop.f32.mrf.mxu0 }
 0xe3b   :  { %v1044_v33 = vadd.f32 %v1041_v44, %v1023_v53 }
 0xe3d   :  { %1511 = vtanh.f32 %v1044_v33  ;;  %v1402_v51 = vmul.f32 -1.442695, %v1044_v33 }
 0xe40   :  { %v954_v55 = vpop.f32.mrf.mxu2 }
 0xe41   :  { %v957_v46 = vadd.f32 %v1787_v50, %v954_v55 }
 0xe43   :  { %v1512_v54 = vpop.eup %1511 }
 0xe44   :  { %1067 = vrot.lane.b32.xlu2 %v1512_v54, %s1609_s30  ;;  %v1990_v54 = vld [vmem:[%s2029_s8] ss:$0 sm:$0xff] }
 0xe4e   :  { %v977_v47 = vpop.f32.mrf.mxu3 }
 0xe4f   :  { %v980_v56 = vadd.f32 %v977_v47, %v957_v46 }
 0xe51   :  { %1513 = vtanh.f32 %v980_v56  ;;  %v1400_v36 = vmul.f32 -1.442695, %v980_v56 }
 0xe52   :  { %1515 = vpow2.f32 %v1402_v51 }
 0xe57   :  { %v1514_v57 = vpop.eup %1513 }
 0xe58   :  { %1003 = vrot.lane.b32.xlu0 %v1514_v57, %s1609_s30  ;;  %v1516_v3 = vpop.eup %1515 }
 0xe59   :  { %v1048_v4 = vadd.f32 1.0, %v1516_v3 }
 0xe5b   :  { %1517 = vrcp.f32 %v1048_v4  ;;  %v1060_v43 = vand.u32 2147483648, %v1048_v4  ;;  %vm1054_vm4 = vweird.f32 %v1048_v4  ;;  %v1058_v50 = vand.u32 2147483647, %v1048_v4 }
 0xe5c   :  { %1519 = vpow2.f32 %v1400_v36 }
 0xe5d   :  { %v1061_v35 = vor.u32 1.1754944e-38, %v1060_v43  ;;  %vm1059_vm7 = vcmp.eq.f32.partialorder %v1058_v50, 8.507059e+37 }
 0xe61   :  { %v1518_v5 = vpop.eup %1517 }
 0xe62   :  { %v1050_v6 = vmul.f32 %v1518_v5, %v1048_v4  ;;  %vm1055_vm3 = vweird.f32 %v1518_v5  ;;  %v1520_v60 = vpop.eup %1519 }
 0xe63   :  { %vm1056_vm6 = vmor %vm1054_vm4, %vm1055_vm3  ;;  %v984_v8 = vadd.f32 1.0, %v1520_v60 }
 0xe64   :  { %v1051_v40 = vsub.f32 1.0, %v1050_v6 }
 0xe65   :  { %1521 = vrcp.f32 %v984_v8  ;;  %v996_v2 = vand.u32 2147483648, %v984_v8  ;;  %vm990_vm9 = vweird.f32 %v984_v8  ;;  %v994_v7 = vand.u32 2147483647, %v984_v8 }
 0xe66   :  { %v1052_v41 = vmul.f32 %v1518_v5, %v1051_v40 }
 0xe67   :  { %v997_v10 = vor.u32 1.1754944e-38, %v996_v2  ;;  %vm995_vm11 = vcmp.eq.f32.partialorder %v994_v7, 8.507059e+37 }
 0xe68   :  { %v1053_v42 = vadd.f32 %v1518_v5, %v1052_v41 }
 0xe6a   :  { %v1057_v34 = vsel %vm1056_vm6, %v1518_v5, %v1053_v42 }
 0xe6b   :  { %v1062_v37 = vsel %vm1059_vm7, %v1061_v35, %v1057_v34  ;;  %v1522_v61 = vpop.eup %1521 }
 0xe6c   :  { %v986_v62 = vmul.f32 %v1522_v61, %v984_v8  ;;  %vm991_vm8 = vweird.f32 %v1522_v61  ;;  %v1065_v14 = vmul.f32 %v1062_v37, %v1931_v27  ;;  %v1328_v27 = vld [vmem:[%s2028_s7 + $0x18] sm:$0xff] }
 0xe6d   :  { %vm992_vm10 = vmor %vm990_vm9, %vm991_vm8  ;;  %1351 = vmatpush.msrb.mxu2 %v1328_v27 }
 0xe6e   :  { %v987_v63 = vsub.f32 1.0, %v986_v62 }
 0xe6f   :  { %1352 = vmatpush.msrb.mxu2 %v1327_v29 }
 0xe70   :  { %v988_v0 = vmul.f32 %v1522_v61, %v987_v63 }
 0xe71   :  { %1353 = vmatpush.msrb.mxu2 %v1326_v30 }
 0xe72   :  { %v989_v1 = vadd.f32 %v1522_v61, %v988_v0 }
 0xe73   :  { %1354 = vmatpush.msrb.mxu2 %v1325_v31 }
 0xe74   :  { %v993_v9 = vsel %vm992_vm10, %v1522_v61, %v989_v1 }
 0xe75   :  { %v998_v12 = vsel %vm995_vm11, %v997_v10, %v993_v9 }
 0xe76   :  { %v1001_v18 = vmul.f32 %v998_v12, %v1936_v38 }
 0xe9e   :  { %v1068_v58 = vpop.permute.xlu2 %1067 }
 0xe9f   :  { %v1070_v59 = vmul.f32 %v1068_v58, %v1062_v37 }
 0xea1   :  { %1072 = vrot.lane.b32.xlu1 %v1070_v59, %s1609_s30 }
 0xeca   :  { %v1004_v11 = vpop.permute.xlu0 %1003 }
 0xecb   :  { %v1006_v13 = vmul.f32 %v1004_v11, %v998_v12 }
 0xecd   :  { %1008 = vrot.lane.b32.xlu2 %v1006_v13, %s1609_s30 }
 0xf13   :  { %v1073_v15 = vpop.permute.xlu1 %1072 }
 0xf14   :  { %v1952_v16 = vadd.f32 %v1073_v15, %v1065_v14 }
 0xf16   :  { %1523 = vtanh.f32 %v1952_v16 }
 0xf1c   :  { %v1524_v17 = vpop.eup %1523 }
 0xf1d   :  { %1078 = vrot.lane.b32.xlu0 %v1524_v17, %s1609_s30 }
 0xf27   :  { %v1009_v19 = vpop.permute.xlu2 %1008 }
 0xf28   :  { %v1957_v20 = vadd.f32 %v1009_v19, %v1001_v18 }
 0xf2a   :  { %1525 = vtanh.f32 %v1957_v20 }
 0xf30   :  { %v1526_v21 = vpop.eup %1525 }
 0xf31   :  { %1014 = vrot.lane.b32.xlu1 %v1526_v21, %s1609_s30 }
 0xf8f   :  { %v1079_v22 = vpop.permute.xlu0 %1078 }
 0xf90   :  { %v1081_v23 = vmul.f32 %v1079_v22, %v1062_v37 }
 0xf92   :  { %1083 = vrot.lane.b32.xlu2 %v1081_v23, %s1610_s4 }
 0xfa3   :  { %v1015_v24 = vpop.permute.xlu1 %1014 }
 0xfa4   :  { %v1017_v25 = vmul.f32 %v1015_v24, %v998_v12 }
 0xfa6   :  { %1019 = vrot.lane.b32.xlu0 %v1017_v25, %s1610_s4 }
 0xfec   :  { %v1084_v26 = vpop.permute.xlu2 %1083 }
 0xfed   :  { %1403 = vmatmul.msk.f32.vlgmr.msrb.gmra.mxu1 %vm118_vm5, %v1084_v26  ;;  %1406 = vmatmul.msk.f32.vlgmr.msra.gmra.mxu3 %vm118_vm5, %v1084_v26 }
0x1018   :  { %v1020_v38 = vpop.permute.xlu0 %1019 }
0x1019   :  { %1022 = vst.msk [vmem:[#allocation3 + $0xa] sm:$0x3] %vm271_vm14, %v1020_v38  ;;  %1404 = vmatmul.msk.f32.vlgmr.msra.gmra.mxu2 %vm118_vm5, %v1020_v38 }
0x1021   :  { %1411 = vmatmul.msk.f32.vlgmr.msrb.gmra.mxu2 %vm118_vm5, %v1323_v39 }
0x106a   :  { %v1104_v28 = vpop.f32.mrf.mxu1 }
0x106b   :  { %v1107_v53 = vadd.f32 %v1984_v52, %v1104_v28 }
0x1070   :  { %v1191_v45 = vpop.f32.mrf.mxu3 }
0x1071   :  { %v1194_v48 = vadd.f32 %v1191_v45, %v1173_v32 }
0x1073   :  { %1527 = vtanh.f32 %v1194_v48  ;;  %v1407_v56 = vmul.f32 -1.442695, %v1194_v48 }
0x1079   :  { %v1528_v49 = vpop.eup %1527 }
0x107a   :  { %1217 = vrot.lane.b32.xlu1 %v1528_v49, %s1609_s30 }
0x109c   :  { %v1127_v44 = vpop.f32.mrf.mxu2 }
0x109d   :  { %v1130_v33 = vadd.f32 %v1127_v44, %v1107_v53 }
0x109f   :  { %1529 = vtanh.f32 %v1130_v33  ;;  %v1405_v3 = vmul.f32 -1.442695, %v1130_v33 }
0x10a0   :  { %1531 = vpow2.f32 %v1407_v56 }
0x10a4   :  { %v1356_v55 = vpop.f32.mrf.mxu2 }
0x10a5   :  { %v1530_v46 = vpop.eup %1529  ;;  %v1357_v47 = vadd.f32 %v1990_v54, %v1356_v55 }
0x10a6   :  { %1153 = vrot.lane.b32.xlu2 %v1530_v46, %s1609_s30  ;;  %v1532_v57 = vpop.eup %1531 }
0x10a7   :  { %1363 = vst.msk [vmem:[%s2030_s9] sm:$0xff] %vm1362_vm12, %v1357_v47  ;;  %v1198_v51 = vadd.f32 1.0, %v1532_v57 }
0x10a9   :  { %1533 = vrcp.f32 %v1198_v51  ;;  %v1210_v50 = vand.u32 2147483648, %v1198_v51  ;;  %vm1204_vm15 = vweird.f32 %v1198_v51  ;;  %v1208_v34 = vand.u32 2147483647, %v1198_v51 }
0x10aa   :  { %1535 = vpow2.f32 %v1405_v3 }
0x10ab   :  { %v1211_v37 = vor.u32 1.1754944e-38, %v1210_v50  ;;  %vm1209_vm1 = vcmp.eq.f32.partialorder %v1208_v34, 8.507059e+37 }
0x10af   :  { %v1534_v4 = vpop.eup %1533 }
0x10b0   :  { %v1200_v5 = vmul.f32 %v1534_v4, %v1198_v51  ;;  %v1536_v6 = vpop.eup %1535  ;;  %vm1205_vm13 = vweird.f32 %v1534_v4 }
0x10b1   :  { %v1134_v41 = vadd.f32 1.0, %v1536_v6  ;;  %vm1206_vm0 = vmor %vm1204_vm15, %vm1205_vm13 }
0x10b2   :  { %v1201_v40 = vsub.f32 1.0, %v1200_v5 }
0x10b3   :  { %1537 = vrcp.f32 %v1134_v41  ;;  %v1146_v0 = vand.u32 2147483648, %v1134_v41  ;;  %vm1140_vm3 = vweird.f32 %v1134_v41  ;;  %v1144_v1 = vand.u32 2147483647, %v1134_v41 }
0x10b4   :  { %v1202_v42 = vmul.f32 %v1534_v4, %v1201_v40 }
0x10b5   :  { %v1147_v7 = vor.u32 1.1754944e-38, %v1146_v0  ;;  %vm1145_vm6 = vcmp.eq.f32.partialorder %v1144_v1, 8.507059e+37 }
0x10b6   :  { %v1203_v43 = vadd.f32 %v1534_v4, %v1202_v42 }
0x10b8   :  { %v1207_v35 = vsel %vm1206_vm0, %v1534_v4, %v1203_v43 }
0x10b9   :  { %v1538_v36 = vpop.eup %1537  ;;  %v1212_v59 = vsel %vm1209_vm1, %v1211_v37, %v1207_v35 }
0x10ba   :  { %v1136_v8 = vmul.f32 %v1538_v36, %v1134_v41  ;;  %vm1141_vm2 = vweird.f32 %v1538_v36  ;;  %v1215_v12 = vmul.f32 %v1212_v59, %v1952_v16 }
0x10bb   :  { %vm1142_vm4 = vmor %vm1140_vm3, %vm1141_vm2 }
0x10bc   :  { %v1137_v61 = vsub.f32 1.0, %v1136_v8 }
0x10be   :  { %v1138_v62 = vmul.f32 %v1538_v36, %v1137_v61 }
0x10c0   :  { %v1139_v63 = vadd.f32 %v1538_v36, %v1138_v62 }
0x10c2   :  { %v1143_v2 = vsel %vm1142_vm4, %v1538_v36, %v1139_v63 }
0x10c3   :  { %v1148_v10 = vsel %vm1145_vm6, %v1147_v7, %v1143_v2 }
0x10c4   :  { %v1151_v17 = vmul.f32 %v1148_v10, %v1957_v20 }
0x10ec   :  { %v1218_v58 = vpop.permute.xlu1 %1217 }
0x10ed   :  { %v1220_v60 = vmul.f32 %v1218_v58, %v1212_v59 }
0x10ef   :  { %1222 = vrot.lane.b32.xlu0 %v1220_v60, %s1609_s30 }
0x1100   :  { %v1154_v9 = vpop.permute.xlu2 %1153 }
0x1101   :  { %v1156_v11 = vmul.f32 %v1154_v9, %v1148_v10 }
0x1103   :  { %1158 = vrot.lane.b32.xlu1 %v1156_v11, %s1609_s30 }
0x1161   :  { %v1223_v13 = vpop.permute.xlu0 %1222 }
0x1162   :  { %v1225_v14 = vadd.f32 %v1223_v13, %v1215_v12 }
0x1164   :  { %1539 = vtanh.f32 %v1225_v14 }
0x116a   :  { %v1540_v15 = vpop.eup %1539 }
0x116b   :  { %1228 = vrot.lane.b32.xlu2 %v1540_v15, %s1609_s30 }
0x1175   :  { %v1159_v18 = vpop.permute.xlu1 %1158 }
0x1176   :  { %v1161_v19 = vadd.f32 %v1159_v18, %v1151_v17 }
0x1178   :  { %1541 = vtanh.f32 %v1161_v19 }
0x117e   :  { %v1542_v21 = vpop.eup %1541 }
0x117f   :  { %1164 = vrot.lane.b32.xlu0 %v1542_v21, %s1609_s30 }
0x11c5   :  { %v1229_v22 = vpop.permute.xlu2 %1228 }
0x11c6   :  { %v1231_v23 = vmul.f32 %v1229_v22, %v1212_v59 }
0x11c8   :  { %1233 = vrot.lane.b32.xlu1 %v1231_v23, %s1610_s4 }
0x11f1   :  { %v1165_v24 = vpop.permute.xlu0 %1164 }
0x11f2   :  { %v1167_v16 = vmul.f32 %v1165_v24, %v1148_v10 }
0x11f4   :  { %1169 = vrot.lane.b32.xlu2 %v1167_v16, %s1610_s4 }
0x123a   :  { %v1234_v25 = vpop.permute.xlu1 %1233 }
0x123b   :  { %1408 = vmatmul.msk.f32.vlgmr.msrb.gmra.mxu0 %vm118_vm5, %v1234_v25 }
0x124e   :  { %v1170_v26 = vpop.permute.xlu2 %1169 }
0x124f   :  { %1172 = vst.msk [vmem:[#allocation3 + $0xc] sm:$0x3] %vm271_vm14, %v1170_v26  ;;  %1409 = vmatmul.msk.f32.vlgmr.msra.gmra.mxu1 %vm118_vm5, %v1170_v26 }
0x12b8   :  { %v1254_v20 = vpop.f32.mrf.mxu0 }
0x12b9   :  { %v1257_v27 = vadd.f32 %v1984_v52, %v1254_v20 }
0x12cc   :  { %v1277_v29 = vpop.f32.mrf.mxu1 }
0x12cd   :  { %v1280_v30 = vadd.f32 %v1277_v29, %v1257_v27 }
0x12cf   :  { %1543 = vtanh.f32 %v1280_v30  ;;  %v1410_v38 = vmul.f32 -1.442695, %v1280_v30 }
0x12d1   :  { %1545 = vpow2.f32 %v1410_v38 }
0x12d5   :  { %v1544_v31 = vpop.eup %1543 }
0x12d6   :  { %1303 = vrot.lane.b32.xlu0 %v1544_v31, %s1609_s30 }
0x12d7   :  { %v1546_v39 = vpop.eup %1545 }
0x12d8   :  { %v1284_v32 = vadd.f32 1.0, %v1546_v39 }
0x12da   :  { %1547 = vrcp.f32 %v1284_v32  ;;  %v1296_v44 = vand.u32 2147483648, %v1284_v32  ;;  %vm1290_vm8 = vweird.f32 %v1284_v32  ;;  %v1294_v52 = vand.u32 2147483647, %v1284_v32 }
0x12dc   :  { %v1297_v55 = vor.u32 1.1754944e-38, %v1296_v44  ;;  %vm1295_vm10 = vcmp.eq.f32.partialorder %v1294_v52, 8.507059e+37 }
0x12e0   :  { %v1548_v45 = vpop.eup %1547 }
0x12e1   :  { %v1286_v48 = vmul.f32 %v1548_v45, %v1284_v32  ;;  %vm1291_vm7 = vweird.f32 %v1548_v45 }
0x12e2   :  { %vm1292_vm9 = vmor %vm1290_vm8, %vm1291_vm7 }
0x12e3   :  { %v1287_v49 = vsub.f32 1.0, %v1286_v48 }
0x12e5   :  { %v1288_v28 = vmul.f32 %v1548_v45, %v1287_v49 }
0x12e7   :  { %v1289_v53 = vadd.f32 %v1548_v45, %v1288_v28 }
0x12e9   :  { %v1293_v33 = vsel %vm1292_vm9, %v1548_v45, %v1289_v53 }
0x12ea   :  { %v1298_v47 = vsel %vm1295_vm10, %v1297_v55, %v1293_v33 }
0x12eb   :  { %v1301_v57 = vmul.f32 %v1298_v47, %v1161_v19 }
0x1348   :  { %v1304_v46 = vpop.permute.xlu0 %1303 }
0x1349   :  { %v1306_v56 = vmul.f32 %v1304_v46, %v1298_v47 }
0x134b   :  { %1308 = vrot.lane.b32.xlu1 %v1306_v56, %s1609_s30 }
0x13bd   :  { %v1309_v51 = vpop.permute.xlu1 %1308 }
0x13be   :  { %v1311_v3 = vadd.f32 %v1309_v51, %v1301_v57 }
0x13c0   :  { %1549 = vtanh.f32 %v1311_v3 }
0x13c6   :  { %v1550_v4 = vpop.eup %1549 }
0x13c7   :  { %1314 = vrot.lane.b32.xlu2 %v1550_v4, %s1609_s30 }
0x1421   :  { %v1315_v5 = vpop.permute.xlu2 %1314 }
0x1422   :  { %v1317_v6 = vmul.f32 %v1315_v5, %v1298_v47 }
0x1424   :  { %1319 = vrot.lane.b32.xlu0 %v1317_v6, %s1610_s4 }
0x1496   :  { %v1320_v40 = vpop.permute.xlu0 %1319 }
0x1497   :  { %1322 = vst.msk [vmem:[#allocation3 + $0xe] sm:$0x3] %vm271_vm14, %v1320_v40 }
0x149e   :  { %v1324_v41 = vld [vmem:[#allocation3 + $0x8] sm:$0xff] }
0x149f   :  { %1412 = vmatmul.msk.f32.gmra.mxu2 %vm118_vm5, %v1324_v41 }
0x1522   :  { %v1359_v42 = vpop.f32.mrf.mxu2 }
0x1523   :  { %v1360_v43 = vadd.f32 %v1990_v54, %v1359_v42 }
0x1525   :  { %1364 = vst.msk [vmem:[%s2030_s9 + $0x8] sm:$0xff] %vm1362_vm12, %v1360_v43 }
0x1526   :  { %1369 = vsyncpa [#allocation5], 1 }
0x1527   :  { %1370 = vsyncpa [#allocation7], 1 }

</bundles_post_ra>
